<compile_context>
chip_gen: v7x
topology: tpu7x:2x2x1
jax: 0.10.0
libtpu: 0.0.40
codegen_flags: <defaults>
</compile_context>

<pallas_src>
import functools
import math

import jax
import jax.numpy as jnp
from jax.experimental import pallas as pl
from jax.experimental.pallas import tpu as pltpu

# dtype for MXU operands; accumulation is always float32.
_MM_DTYPE = jnp.bfloat16


def _act_dtype_for_device():
    """bf16 activations on bf16-native VPU/EUP chips (v6e/v7x), f32 otherwise."""
    try:
        kind = jax.devices()[0].device_kind.lower()
    except Exception:
        return jnp.float32
    if any(v in kind for v in ("v2", "v3", "v4", "v5")):
        return jnp.float32
    return jnp.bfloat16


def lau_kernel(att_ref, w1_ref, b1_ref, w2_ref, b2_ref, w3_ref, b3_ref, o_ref,
               *, act_dtype):
    bb, t, k1 = att_ref.shape
    rows = bb * t

    # (bb, T, 4E) -> (rows, 4E): free re-interpretation (T % 16 == 0).
    att = att_ref[...].reshape(rows, k1)                              # bf16

    # Layer 1: one stacked matmul (rows/8 MXU pushes) + bias + sigmoid.
    z1 = jnp.dot(att, w1_ref[...],
                 preferred_element_type=jnp.float32) + b1_ref[...]
    h1 = jax.nn.sigmoid(z1.astype(act_dtype))                         # (rows, H1)

    # Layer 2: Linear(H1 -> H2) + sigmoid.
    z2 = jnp.dot(h1.astype(_MM_DTYPE), w2_ref[...],
                 preferred_element_type=jnp.float32) + b2_ref[...]
    h2 = jax.nn.sigmoid(z2.astype(act_dtype))                         # (rows, H2)

    # Final Linear(H2 -> 1): VPU multiply + lane reduce; b3 from SMEM.
    score = jnp.sum(h2.astype(jnp.float32) * w3_ref[...], axis=-1) + b3_ref[0]

    # Lane-dense store: one (1, 1, rows) slab per grid step (rows % 128 == 0).
    o_ref[...] = score.reshape(1, 1, rows).astype(o_ref.dtype)


def local_activation_unit(query, user_behavior, params, *, block_rows=2048):
    """query: (B, 1, E), user_behavior: (B, T, E) -> (B, T, 1) float32."""
    B, T, E = user_behavior.shape
    w1, b1, w2, b2, w3, b3 = params
    H1 = w1.shape[1]
    H2 = w2.shape[1]

    # ---- attention_input staged in XLA (exactly the module's expand + cat) --
    q = jnp.broadcast_to(query.astype(jnp.float32), (B, T, E))
    k = user_behavior.astype(jnp.float32)
    att = jnp.concatenate([q, k, q - k, q * k], axis=-1).astype(_MM_DTYPE)

    # ---- pad T to a multiple of 16 (free bf16 reshape inside the kernel) ----
    t_pad = -(-T // 16) * 16
    if t_pad != T:
        att = jnp.pad(att, ((0, 0), (0, t_pad - T), (0, 0)))

    # ---- batch-block size: many rows per grid step, rows % 128 == 0 ---------
    lane = 128
    mult = lane // math.gcd(t_pad, lane)          # bb multiple => rows % 128 == 0
    bb = max(1, block_rows // t_pad)
    bb = max(mult, (bb // mult) * mult)
    # Keep >= 2 grid steps when B allows (v7x: two TensorCores on the parallel
    # axis); never shrink a block below ~256 rows for this.
    while pl.cdiv(B, bb) < 2 and bb > mult and bb * t_pad > 256:
        bb = max(mult, ((bb // 2) // mult) * mult)
    num_blocks = pl.cdiv(B, bb)
    b_pad = num_blocks * bb
    if b_pad != B:
        att = jnp.pad(att, ((0, b_pad - B), (0, 0), (0, 0)))
    rows = bb * t_pad
    # Per-step VMEM (lane-padded): ~rows*256 B of bf16 input x 2 buffers plus a
    # few (rows, 128)-padded f32 intermediates -> ~5 MiB at rows=2048, well
    # under the scoped defaults on v5e (16 MiB) and v6e/v7x (32 MiB).

    # ---- weights / biases ----------------------------------------------------
    act_dtype = _act_dtype_for_device()
    w1c = w1.astype(_MM_DTYPE)                          # (4E, H1)
    w2c = w2.astype(_MM_DTYPE)                          # (H1, H2)
    b1r = b1.reshape(1, H1).astype(jnp.float32)
    b2r = b2.reshape(1, H2).astype(jnp.float32)
    w3r = w3.reshape(1, H2).astype(jnp.float32)         # row vector (VPU reduce)
    b3s = jnp.asarray(b3, jnp.float32).reshape(1)       # SMEM scalar

    def full(a):
        nd = a.ndim
        return pl.BlockSpec(a.shape, lambda g, _nd=nd: (0,) * _nd)

    out = pl.pallas_call(
        functools.partial(lau_kernel, act_dtype=act_dtype),
        out_shape=jax.ShapeDtypeStruct((num_blocks, 1, rows), jnp.float32),
        grid_spec=pltpu.PrefetchScalarGridSpec(
            num_scalar_prefetch=0,
            grid=(num_blocks,),
            in_specs=[
                pl.BlockSpec((bb, t_pad, 4 * E), lambda g: (g, 0, 0)),   # att
                full(w1c), full(b1r), full(w2c), full(b2r), full(w3r),
                pl.BlockSpec(memory_space=pltpu.MemorySpace.SMEM),       # b3
            ],
            out_specs=pl.BlockSpec((1, 1, rows), lambda g: (g, 0, 0)),
        ),
        compiler_params=pltpu.CompilerParams(
            dimension_semantics=("parallel",)),
    )(att, w1c, b1r, w2c, b2r, w3r, b3s)

    # (num_blocks, 1, bb*t_pad) -> (B, T, 1)
    return out.reshape(b_pad, t_pad)[:B, :T].reshape(B, T, 1)


def init_params(key, embedding_dim=4, hidden_units=(64, 32), init_std=1e-4):
    """Synthetic init matching the module's parameter shapes.

    Weights are stored as (in, out) = PyTorch Linear weight transposed, so the
    math is x @ W + b == x @ weight.T + bias.
    """
    dims = [4 * embedding_dim] + list(hidden_units)
    keys = jax.random.split(key, 8)
    w1 = init_std * jax.random.normal(keys[0], (dims[0], dims[1]), jnp.float32)
    b1 = 0.01 * jax.random.normal(keys[1], (1, dims[1]), jnp.float32)
    w2 = init_std * jax.random.normal(keys[2], (dims[1], dims[2]), jnp.float32)
    b2 = 0.01 * jax.random.normal(keys[3], (1, dims[2]), jnp.float32)
    w3 = 0.1 * jax.random.normal(keys[4], (dims[2], 1), jnp.float32)
    b3 = 0.01 * jax.random.normal(keys[5], (1, 1), jnp.float32)
    return (w1, b1, w2, b2, w3, b3)


def reference_forward(query, user_behavior, params):
    w1, b1, w2, b2, w3, b3 = params
    q = jnp.broadcast_to(query, user_behavior.shape)
    x = jnp.concatenate(
        [q, user_behavior, q - user_behavior, q * user_behavior], axis=-1)
    h1 = jax.nn.sigmoid(x @ w1 + b1)
    h2 = jax.nn.sigmoid(h1 @ w2 + b2)
    return h2 @ w3 + b3


if __name__ == "__main__":
    key = jax.random.PRNGKey(0)

    def run_case(B, T, E, case_key):
        kq, kub, kp = jax.random.split(case_key, 3)
        query = jax.random.normal(kq, (B, 1, E), jnp.float32)
        ub = jax.random.normal(kub, (B, T, E), jnp.float32)
        # Larger init_std than the module default so scores actually vary with
        # the inputs and a broken kernel cannot hide behind tiny magnitudes.
        params = init_params(kp, embedding_dim=E, hidden_units=(64, 32),
                             init_std=0.1)
        out = jax.block_until_ready(local_activation_unit(query, ub, params))
        ref = reference_forward(query, ub, params)
        assert out.shape == (B, T, 1)
        err = float(jnp.max(jnp.abs(out - ref)))
        # bf16 MXU operands (and bf16 sigmoids on v6e/v7x) -> loose-ish bound.
        assert err < 1.5e-2, f"max abs err {err}"
        return out

    # Small canonical case (embedding_dim=4, seq=8, batch=2).
    run_case(2, 8, 4, jax.random.fold_in(key, 0))
    # Ragged case: T not a multiple of 8/16, B not a multiple of bb, and >= 2
    # grid blocks — exercises the T/B padding, multi-block and slicing paths.
    run_case(40, 10, 4, jax.random.fold_in(key, 1))

    print("KERNEL_OK")
</pallas_src>

<mosaic_0001>
module attributes {stable_mosaic.version = 11 : i64} {
  func.func @lau_kernel(%arg0: i32, %arg1: memref<16x16x16xbf16, #tpu.memory_space<vmem>>, %arg2: memref<16x64xbf16, #tpu.memory_space<vmem>>, %arg3: memref<1x64xf32, #tpu.memory_space<vmem>>, %arg4: memref<64x32xbf16, #tpu.memory_space<vmem>>, %arg5: memref<1x32xf32, #tpu.memory_space<vmem>>, %arg6: memref<1x32xf32, #tpu.memory_space<vmem>>, %arg7: memref<1xf32, #tpu.memory_space<smem>>, %arg8: memref<1x1x256xf32, #tpu.memory_space<vmem>>) attributes {dimension_semantics = [#tpu.dimension_semantics<parallel>], iteration_bounds = array<i64: 1>, scalar_prefetch = 0 : i64, scratch_operands = 0 : i64, tpu.core_type = #tpu.core_type<tc>, window_params = [{transform_indices = @transform_0, window_bounds = array<i64: 16, 16, 16>}, {pipeline_mode = #tpu.pipeline_mode<synchronous>, transform_indices = @transform_1, window_bounds = array<i64: 16, 64>}, {pipeline_mode = #tpu.pipeline_mode<synchronous>, transform_indices = @transform_2, window_bounds = array<i64: 1, 64>}, {pipeline_mode = #tpu.pipeline_mode<synchronous>, transform_indices = @transform_3, window_bounds = array<i64: 64, 32>}, {pipeline_mode = #tpu.pipeline_mode<synchronous>, transform_indices = @transform_4, window_bounds = array<i64: 1, 32>}, {pipeline_mode = #tpu.pipeline_mode<synchronous>, transform_indices = @transform_5, window_bounds = array<i64: 1, 32>}, {transform_indices = @transform_6, window_bounds = array<i64: 1>}, {transform_indices = @transform_7, window_bounds = array<i64: 1, 1, 256>}]} {
    %c0 = arith.constant 0 : index
    %c0_0 = arith.constant 0 : index
    %c0_1 = arith.constant 0 : index
    %0 = vector.load %arg1[%c0, %c0_0, %c0_1] : memref<16x16x16xbf16, #tpu.memory_space<vmem>>, vector<16x16x16xbf16>
    %1 = vector.shape_cast %0 : vector<16x16x16xbf16> to vector<256x16xbf16>
    %c0_2 = arith.constant 0 : index
    %c0_3 = arith.constant 0 : index
    %2 = vector.load %arg2[%c0_2, %c0_3] : memref<16x64xbf16, #tpu.memory_space<vmem>>, vector<16x64xbf16>
    %cst = arith.constant dense<0.000000e+00> : vector<256x64xf32>
    %3 = tpu.matmul %1, %2, %cst {dimension_numbers = #tpu.dot_dimension_numbers<[1], [0], [0], [1], [0, 0, 1, 1], [], []>} : vector<256x16xbf16>, vector<16x64xbf16>, vector<256x64xf32> -> vector<256x64xf32>
    %c0_4 = arith.constant 0 : index
    %c0_5 = arith.constant 0 : index
    %4 = vector.load %arg3[%c0_4, %c0_5] : memref<1x64xf32, #tpu.memory_space<vmem>>, vector<1x64xf32>
    %5 = vector.broadcast %4 : vector<1x64xf32> to vector<256x64xf32>
    %6 = arith.addf %3, %5 : vector<256x64xf32>
    %7 = arith.truncf %6 : vector<256x64xf32> to vector<256x64xbf16>
    %8 = arith.negf %7 : vector<256x64xbf16>
    %9 = math.exp %8 : vector<256x64xbf16>
    %cst_6 = arith.constant 1.000000e+00 : bf16
    %10 = vector.broadcast %cst_6 : bf16 to vector<256x64xbf16>
    %11 = arith.addf %10, %9 : vector<256x64xbf16>
    %12 = arith.divf %10, %11 : vector<256x64xbf16>
    %c0_7 = arith.constant 0 : index
    %c0_8 = arith.constant 0 : index
    %13 = vector.load %arg4[%c0_7, %c0_8] : memref<64x32xbf16, #tpu.memory_space<vmem>>, vector<64x32xbf16>
    %cst_9 = arith.constant dense<0.000000e+00> : vector<256x32xf32>
    %14 = tpu.matmul %12, %13, %cst_9 {dimension_numbers = #tpu.dot_dimension_numbers<[1], [0], [0], [1], [0, 0, 1, 1], [], []>} : vector<256x64xbf16>, vector<64x32xbf16>, vector<256x32xf32> -> vector<256x32xf32>
    %c0_10 = arith.constant 0 : index
    %c0_11 = arith.constant 0 : index
    %15 = vector.load %arg5[%c0_10, %c0_11] : memref<1x32xf32, #tpu.memory_space<vmem>>, vector<1x32xf32>
    %16 = vector.broadcast %15 : vector<1x32xf32> to vector<256x32xf32>
    %17 = arith.addf %14, %16 : vector<256x32xf32>
    %18 = arith.truncf %17 : vector<256x32xf32> to vector<256x32xbf16>
    %19 = arith.negf %18 : vector<256x32xbf16>
    %20 = math.exp %19 : vector<256x32xbf16>
    %cst_12 = arith.constant 1.000000e+00 : bf16
    %21 = vector.broadcast %cst_12 : bf16 to vector<256x32xbf16>
    %22 = arith.addf %21, %20 : vector<256x32xbf16>
    %23 = arith.divf %21, %22 : vector<256x32xbf16>
    %24 = arith.extf %23 : vector<256x32xbf16> to vector<256x32xf32>
    %c0_13 = arith.constant 0 : index
    %c0_14 = arith.constant 0 : index
    %25 = vector.load %arg6[%c0_13, %c0_14] : memref<1x32xf32, #tpu.memory_space<vmem>>, vector<1x32xf32>
    %26 = vector.broadcast %25 : vector<1x32xf32> to vector<256x32xf32>
    %27 = arith.mulf %24, %26 : vector<256x32xf32>
    %cst_15 = arith.constant dense<0.000000e+00> : vector<256xf32>
    %28 = vector.multi_reduction <add>, %27, %cst_15 [1] : vector<256x32xf32> to vector<256xf32>
    %c0_16 = arith.constant 0 : index
    %29 = memref.load %arg7[%c0_16] : memref<1xf32, #tpu.memory_space<smem>>
    %30 = vector.broadcast %29 : f32 to vector<256xf32>
    %31 = arith.addf %28, %30 : vector<256xf32>
    %32 = vector.shape_cast %31 : vector<256xf32> to vector<1x1x256xf32>
    %c0_17 = arith.constant 0 : index
    %c0_18 = arith.constant 0 : index
    %c0_19 = arith.constant 0 : index
    %33 = vector.load %arg8[%c0_17, %c0_18, %c0_19] : memref<1x1x256xf32, #tpu.memory_space<vmem>>, vector<1x1x256xf32>
    tpu.vector_store %arg8[%c0_17, %c0_18, %c0_19], %32 {strides = array<i32>} : memref<1x1x256xf32, #tpu.memory_space<vmem>>, vector<1x1x256xf32>,
    return
  }
  func.func @transform_0(%arg0: i32) -> (i32, i32, i32) {
    %c0_i32 = arith.constant 0 : i32
    %c0_i32_0 = arith.constant 0 : i32
    %c0_i32_1 = arith.constant 0 : i32
    return %arg0, %c0_i32, %c0_i32_0 : i32, i32, i32
  }
  func.func @transform_1(%arg0: i32) -> (i32, i32) {
    %c0_i32 = arith.constant 0 : i32
    %c0_i32_0 = arith.constant 0 : i32
    %c0_i32_1 = arith.constant 0 : i32
    return %c0_i32, %c0_i32_0 : i32, i32
  }
  func.func @transform_2(%arg0: i32) -> (i32, i32) {
    %c0_i32 = arith.constant 0 : i32
    %c0_i32_0 = arith.constant 0 : i32
    %c0_i32_1 = arith.constant 0 : i32
    return %c0_i32, %c0_i32_0 : i32, i32
  }
  func.func @transform_3(%arg0: i32) -> (i32, i32) {
    %c0_i32 = arith.constant 0 : i32
    %c0_i32_0 = arith.constant 0 : i32
    %c0_i32_1 = arith.constant 0 : i32
    return %c0_i32, %c0_i32_0 : i32, i32
  }
  func.func @transform_4(%arg0: i32) -> (i32, i32) {
    %c0_i32 = arith.constant 0 : i32
    %c0_i32_0 = arith.constant 0 : i32
    %c0_i32_1 = arith.constant 0 : i32
    return %c0_i32, %c0_i32_0 : i32, i32
  }
  func.func @transform_5(%arg0: i32) -> (i32, i32) {
    %c0_i32 = arith.constant 0 : i32
    %c0_i32_0 = arith.constant 0 : i32
    %c0_i32_1 = arith.constant 0 : i32
    return %c0_i32, %c0_i32_0 : i32, i32
  }
  func.func @transform_6(%arg0: i32) -> i32 {
    %c0_i32 = arith.constant 0 : i32
    %c0_i32_0 = arith.constant 0 : i32
    return %c0_i32 : i32
  }
  func.func @transform_7(%arg0: i32) -> (i32, i32, i32) {
    %c0_i32 = arith.constant 0 : i32
    %c0_i32_0 = arith.constant 0 : i32
    %c0_i32_1 = arith.constant 0 : i32
    return %arg0, %c0_i32, %c0_i32_0 : i32, i32, i32
  }
}

</mosaic_0001>

<bundles_post_ra>
// kernel: tpu_custom_call.1
= control target key start
LH: loop header
LB: loop body
LE: loop exit
PB: predicated region body
PF: predicated region fallthrough
CT: control target
= control target key end

     0   :  { %13 = vsyncpa [#allocation4], 0  ;;  %s5594_s0 = inlined_call_operand.hbm [shape: bf16[16,16,16], index: 0, kind: input, shape index: {}]   ;;  %s5595_s1 = inlined_call_operand.vmem [shape: bf16[16,64], index: 1, kind: input, shape index: {}]   ;;  %s5596_s2 = inlined_call_operand.vmem [shape: f32[1,64], index: 2, kind: input, shape index: {}]   ;;  %s5597_s3 = inlined_call_operand.vmem [shape: bf16[64,32], index: 3, kind: input, shape index: {}]   ;;  %s5598_s4 = inlined_call_operand.vmem [shape: f32[1,32], index: 4, kind: input, shape index: {}]   ;;  %s5599_s5 = inlined_call_operand.vmem [shape: f32[1,32], index: 5, kind: input, shape index: {}]   ;;  %s5600_s6 = inlined_call_operand.<no memory space> [shape: f32[1], index: 6, kind: input, shape index: {}]   ;;  %s5601_s7 = inlined_call_operand.hbm [shape: f32[1,1,256], index: 7, kind: output, shape index: {}]  }
   0x1   :  { %14 = vsyncpa [#allocation5], 0  ;;  %s4438_s24 = smov [#allocation3]   ;;  %s4390_s28 = scalar_lea.hbm %s5594_s0, 2048 }
   0x2   :  { %s20_s25 = sshll.u32 %s4438_s24, 4  ;;  %p4391_p0 = scmp.ne.s32.totalorder %s5594_s0, %s4390_s28  ;;  %s21_s25 = int_to_ptr.vmem [resolvable:$true] %s20_s25 }
   0x3   :  { %p4394_p1 = scmp.lt.u32.totalorder %s4390_s28, %s5594_s0 }
   0x5   :  { %p4396_p2 = pnand %p4394_p1, %p4391_p0 }
   0x7   :  { %4399 = shalt.err (!%p4396_p2)
}
   0x8   :  { %s4400_s10 = scalar_lea.vmem %s21_s25, 2048  ;;  %p4405_p4 = scmp.lt.s32.totalorder %s21_s25, %s21_s25 }
   0x9   :  { %p4401_p3 = scmp.ne.s32.totalorder %s21_s25, %s4400_s10  ;;  %p4406_p5 = scmp.lt.s32.totalorder %s4400_s10, %s4400_s10 }
   0xb   :  { %p4407_p6 = por %p4406_p5, %p4405_p4 }
   0xd   :  { %p4408_p7 = pnand %p4407_p6, %p4401_p3 }
   0xf   :  { %4411 = shalt.err (!%p4408_p7)
}
  0x10   :  { %s4439_s11 = smov 64   ;;  %s4440_s12 = smov 4  }
  0x11   :  { %26 = dma.hbm_to_vmem [thread:$0]  %s5594_s0, 2048, %s21_s25, [#allocation4], %s4439_s11, %s4439_s11, %s4440_s12  }
  0x12   :  { %4434 = dma.done.wait [#allocation4], 2048  }
  0x13   :  { %4435 = vsyncadd [#allocation4], 4294965248  ;;  %v4241_v0 = vld [vmem:[%s5595_s1] sm:$0xff]   ;;  %vm171_vm0 = vcmask 130048   ;;  %v4243_v2 = vld [vmem:[#allocation3 + $0x8] sm:$0xff]   ;;  %vm548_vm1 = vcmask 523264  }
  0x14   :  { %v4242_v1 = vld [vmem:[#allocation3] sm:$0xff]   ;;  %4159 = vmatprep.subr.bf16.mxu0 %v4241_v0  ;;  %v4244_v3 = vld [vmem:[#allocation3 + $0x10] sm:$0xff]   ;;  %v4245_v4 = vld [vmem:[#allocation3 + $0x18] sm:$0xff]   ;;  %vm957_vm2 = vcmask 261120   ;;  %vm3819_vm3 = vcmask 130112   ;;  %vm3826_vm4 = vcmask 195712  }
  0x15   :  { %4160 = vmatpush3.bf16.msra.mxu0 %v4241_v0  ;;  %4161 = vmatprep.mubr.msk.bf16.mxu0 %vm171_vm0, %v4242_v1  ;;  %v4246_v5 = vld [vmem:[#allocation3 + $0x20] sm:$0xff]   ;;  %v4247_v6 = vld [vmem:[#allocation3 + $0x28] sm:$0xff]   ;;  %v4248_v7 = vld [vmem:[#allocation3 + $0x30] sm:$0xff]   ;;  %vm3833_vm5 = vcmask 261312   ;;  %vm3840_vm6 = vcmask 326912   ;;  %vm3847_vm7 = vcmask 392512  }
  0x16   :  { %v4249_v8 = vld [vmem:[#allocation3 + $0x38] sm:$0xff]   ;;  %v4250_v9 = vld [vmem:[#allocation3 + $0x40] sm:$0xff]   ;;  %v4251_v10 = vld [vmem:[#allocation3 + $0x48] sm:$0xff]   ;;  %vm3854_vm8 = vcmask 458112   ;;  %vm3861_vm9 = vcmask 523712   ;;  %vm3868_vm10 = vcmask 589312  }
  0x17   :  { %v4252_v11 = vld [vmem:[#allocation3 + $0x50] sm:$0xff]   ;;  %v4253_v12 = vld [vmem:[#allocation3 + $0x58] sm:$0xff]   ;;  %v4254_v13 = vld [vmem:[#allocation3 + $0x60] sm:$0xff]   ;;  %vm3875_vm11 = vcmask 654912   ;;  %vm3882_vm12 = vcmask 720512   ;;  %vm3889_vm13 = vcmask 786112  }
  0x18   :  { %4162 = vmatmul.mubr.msk.bf16.vlgmr.msra.gmra.mrb[0].mxu0 %vm171_vm0, %v4243_v2  ;;  %v4255_v14 = vld [vmem:[#allocation3 + $0x68] sm:$0xff]   ;;  %v4256_v15 = vld [vmem:[#allocation3 + $0x70] sm:$0xff]   ;;  %v4257_v16 = vld [vmem:[#allocation3 + $0x78] sm:$0xff]   ;;  %vm3896_vm14 = vcmask 851712   ;;  %vm3903_vm15 = vcmask 917312  }
  0x19   :  { %4165 = vmatprep.mubr.msk.bf16.mxu0 %vm171_vm0, %v4244_v3  ;;  %v4258_v17 = vld [vmem:[%s5597_s3] sm:$0xff]   ;;  %v4259_v18 = vld [vmem:[%s5597_s3 + $0x8] sm:$0xff]   ;;  %v4260_v19 = vld [vmem:[%s5597_s3 + $0x10] sm:$0xff]  }
  0x1a   :  { %4193 = vmatprep.subr.bf16.mxu1 %v4258_v17  ;;  %v4261_v20 = vld [vmem:[%s5597_s3 + $0x18] sm:$0xff]   ;;  %v4530_v22 = vld [vmem:[%s5596_s2] ss:$0 sm:$0xff] }
  0x1b   :  { %4194 = vmatpush3.bf16.msra.mxu1 %v4258_v17 }
  0x1c   :  { %4195 = vmatprep.subr.bf16.mxu1 %v4259_v18 }
  0x1f   :  { %4196 = vmatpush3.bf16.msra.mxu1 %v4259_v18 }
  0x20   :  { %4166 = vmatmul.mubr.msk.bf16.gmra.mrb[4].mxu0 %vm171_vm0, %v4245_v4  ;;  %4197 = vmatprep.subr.bf16.mxu1 %v4260_v19 }
  0x21   :  { %4169 = vmatprep.mubr.msk.bf16.mxu0 %vm171_vm0, %v4246_v5 }
  0x23   :  { %4198 = vmatpush3.bf16.msra.mxu1 %v4260_v19 }
  0x24   :  { %4199 = vmatprep.subr.bf16.mxu1 %v4261_v20 }
  0x27   :  { %4200 = vmatpush3.bf16.msra.mxu1 %v4261_v20 }
  0x28   :  { %4170 = vmatmul.mubr.msk.bf16.gmra.mrb[8].mxu0 %vm171_vm0, %v4247_v6 }
  0x29   :  { %4173 = vmatprep.mubr.msk.bf16.mxu0 %vm171_vm0, %v4248_v7 }
  0x30   :  { %4174 = vmatmul.mubr.msk.bf16.gmra.mrb[12].mxu0 %vm171_vm0, %v4249_v8 }
  0x31   :  { %4177 = vmatprep.mubr.msk.bf16.mxu0 %vm171_vm0, %v4250_v9 }
  0x38   :  { %4178 = vmatmul.mubr.msk.bf16.gmra.mrb[16].mxu0 %vm171_vm0, %v4251_v10 }
  0x39   :  { %4181 = vmatprep.mubr.msk.bf16.mxu0 %vm171_vm0, %v4252_v11 }
  0x40   :  { %4182 = vmatmul.mubr.msk.bf16.gmra.mrb[20].mxu0 %vm171_vm0, %v4253_v12 }
  0x41   :  { %4185 = vmatprep.mubr.msk.bf16.mxu0 %vm171_vm0, %v4254_v13 }
  0x48   :  { %4186 = vmatmul.mubr.msk.bf16.gmra.mrb[24].mxu0 %vm171_vm0, %v4255_v14 }
  0x49   :  { %4189 = vmatprep.mubr.msk.bf16.mxu0 %vm171_vm0, %v4256_v15 }
  0x50   :  { %4190 = vmatmul.mubr.msk.bf16.gmra.mrb[28].mxu0 %vm171_vm0, %v4257_v16  ;;  %vm3910_vm0 = vcmask 982912  }
  0xeb   :  { %v4163_v21 = vpop.f32.mrb[0].mxu0 }
  0xec   :  { %v254_v23 = vpop.f32.mrb[1].mxu0  ;;  %v263_v25 = vadd.f32 %v4163_v21, %v4530_v22 }
  0xed   :  { %v4164_v24 = vpop.f32.mrb[2].mxu0  ;;  %v255_v28 = vadd.f32 %v4530_v22, %v254_v23 }
  0xee   :  { %v266_v26 = vadd.f32 %v4164_v24, %v4530_v22  ;;  %v257_v27 = vpop.f32.mrb[3].mxu0 }
  0xef   :  { %v258_v29 = vadd.f32 %v4530_v22, %v257_v27 }
  0xf0   :  { %v382_v30 = vpack.c.bf16 %v266_v26, %v263_v25 }
  0xf1   :  { %v381_v31 = vpack.c.bf16 %v258_v29, %v255_v28 }
  0xf2   :  { %v4069_v32 = vmul.bf16 3216621497, %v382_v30 }
  0xf3   :  { %v4068_v33 = vmul.bf16 3216621497, %v381_v31  ;;  %v4167_v34 = vpop.f32.mrb[4].mxu0 }
  0xf4   :  { %4262 = vpow.bf16 %v4069_v32  ;;  %v270_v35 = vpop.f32.mrb[5].mxu0  ;;  %v279_v37 = vadd.f32 %v4167_v34, %v4530_v22 }
  0xf5   :  { %4264 = vpow.bf16 %v4068_v33  ;;  %v4168_v36 = vpop.f32.mrb[6].mxu0  ;;  %v271_v40 = vadd.f32 %v4530_v22, %v270_v35 }
  0xf6   :  { %v282_v38 = vadd.f32 %v4168_v36, %v4530_v22  ;;  %v273_v39 = vpop.f32.mrb[7].mxu0 }
  0xf7   :  { %v274_v41 = vadd.f32 %v4530_v22, %v273_v39 }
  0xf8   :  { %v384_v42 = vpack.c.bf16 %v282_v38, %v279_v37 }
  0xf9   :  { %v383_v43 = vpack.c.bf16 %v274_v41, %v271_v40 }
  0xfa   :  { %v4071_v44 = vmul.bf16 3216621497, %v384_v42 }
  0xfb   :  { %v4070_v45 = vmul.bf16 3216621497, %v383_v43  ;;  %v4171_v46 = vpop.f32.mrb[8].mxu0 }
  0xfc   :  { %4266 = vpow.bf16 %v4071_v44  ;;  %v286_v47 = vpop.f32.mrb[9].mxu0  ;;  %v295_v49 = vadd.f32 %v4171_v46, %v4530_v22 }
  0xfd   :  { %4268 = vpow.bf16 %v4070_v45  ;;  %v4172_v48 = vpop.f32.mrb[10].mxu0  ;;  %v287_v53 = vadd.f32 %v4530_v22, %v286_v47 }
  0xfe   :  { %v298_v50 = vadd.f32 %v4172_v48, %v4530_v22  ;;  %v289_v51 = vpop.f32.mrb[11].mxu0 }
  0xff   :  { %v4263_v52 = vpop.eup %4262  ;;  %v290_v54 = vadd.f32 %v4530_v22, %v289_v51 }
 0x100   :  { %v4265_v55 = vpop.eup %4264  ;;  %v462_v56 = vadd.bf16 1065369472, %v4263_v52  ;;  %v386_v57 = vpack.c.bf16 %v298_v50, %v295_v49 }
 0x101   :  { %v385_v58 = vpack.c.bf16 %v290_v54, %v287_v53  ;;  %v461_v59 = vadd.bf16 1065369472, %v4265_v55 }
 0x102   :  { %4270 = vrcp.bf16 %v462_v56  ;;  %v4073_v60 = vmul.bf16 3216621497, %v386_v57 }
 0x103   :  { %v4072_v61 = vmul.bf16 3216621497, %v385_v58  ;;  %v4175_v62 = vpop.f32.mrb[12].mxu0  ;;  %4272 = vrcp.bf16 %v461_v59 }
 0x104   :  { %4274 = vpow.bf16 %v4073_v60  ;;  %v302_v63 = vpop.f32.mrb[13].mxu0  ;;  %v311_v1 = vadd.f32 %v4175_v62, %v4530_v22 }
 0x105   :  { %4276 = vpow.bf16 %v4072_v61  ;;  %v4176_v0 = vpop.f32.mrb[14].mxu0  ;;  %v303_v5 = vadd.f32 %v4530_v22, %v302_v63 }
 0x106   :  { %v314_v2 = vadd.f32 %v4176_v0, %v4530_v22  ;;  %v305_v3 = vpop.f32.mrb[15].mxu0 }
 0x107   :  { %v4267_v4 = vpop.eup %4266  ;;  %v306_v6 = vadd.f32 %v4530_v22, %v305_v3 }
 0x108   :  { %v4269_v7 = vpop.eup %4268  ;;  %v464_v8 = vadd.bf16 1065369472, %v4267_v4  ;;  %v388_v9 = vpack.c.bf16 %v314_v2, %v311_v1 }
 0x109   :  { %v463_v10 = vadd.bf16 1065369472, %v4269_v7  ;;  %v387_v11 = vpack.c.bf16 %v306_v6, %v303_v5 }
 0x10a   :  { %4278 = vrcp.bf16 %v464_v8  ;;  %v4075_v12 = vmul.bf16 3216621497, %v388_v9 }
 0x10b   :  { %4280 = vrcp.bf16 %v463_v10  ;;  %v4074_v13 = vmul.bf16 3216621497, %v387_v11  ;;  %v4179_v14 = vpop.f32.mrb[16].mxu0 }
 0x10c   :  { %4282 = vpow.bf16 %v4075_v12  ;;  %v318_v15 = vpop.f32.mrb[17].mxu0  ;;  %v327_v19 = vadd.f32 %v4179_v14, %v4530_v22 }
 0x10d   :  { %v4271_v16 = vpop.eup %4270  ;;  %4284 = vpow.bf16 %v4074_v13  ;;  %v4180_v17 = vpop.f32.mrb[18].mxu0  ;;  %v319_v24 = vadd.f32 %v4530_v22, %v318_v15 }
 0x10e   :  { %v4273_v18 = vpop.eup %4272  ;;  %v330_v20 = vadd.f32 %v4180_v17, %v4530_v22  ;;  %v321_v21 = vpop.f32.mrb[19].mxu0  ;;  %v480_v30 = vmul.bf16 1065369472, %v4271_v16 }
 0x10f   :  { %v4275_v23 = vpop.eup %4274  ;;  %v322_v25 = vadd.f32 %v4530_v22, %v321_v21  ;;  %v478_v26 = vmul.bf16 1065369472, %v4273_v18 }
 0x110   :  { %v4277_v27 = vpop.eup %4276  ;;  %v466_v28 = vadd.bf16 1065369472, %v4275_v23  ;;  %v390_v29 = vpack.c.bf16 %v330_v20, %v327_v19 }
 0x111   :  { %v465_v31 = vadd.bf16 1065369472, %v4277_v27  ;;  %v389_v32 = vpack.c.bf16 %v322_v25, %v319_v24  ;;  %4201 = vmatprep.mubr.msk.bf16.mxu1 %vm548_vm1, %v478_v26 }
 0x112   :  { %4286 = vrcp.bf16 %v466_v28  ;;  %v4077_v33 = vmul.bf16 3216621497, %v390_v29  ;;  %4202 = vmatmul.mubr.msk.bf16.vlgmr.msra.gmra.mrb[0].mxu1 %vm548_vm1, %v480_v30 }
 0x113   :  { %4288 = vrcp.bf16 %v465_v31  ;;  %v4076_v34 = vmul.bf16 3216621497, %v389_v32  ;;  %v4183_v35 = vpop.f32.mrb[20].mxu0 }
 0x114   :  { %4290 = vpow.bf16 %v4077_v33  ;;  %v334_v36 = vpop.f32.mrb[21].mxu0  ;;  %v343_v40 = vadd.f32 %v4183_v35, %v4530_v22 }
 0x115   :  { %v4279_v37 = vpop.eup %4278  ;;  %4292 = vpow.bf16 %v4076_v34  ;;  %v4184_v38 = vpop.f32.mrb[22].mxu0  ;;  %v335_v44 = vadd.f32 %v4530_v22, %v334_v36 }
 0x116   :  { %v4281_v39 = vpop.eup %4280  ;;  %v346_v41 = vadd.f32 %v4184_v38, %v4530_v22  ;;  %v337_v42 = vpop.f32.mrb[23].mxu0  ;;  %v484_v50 = vmul.bf16 1065369472, %v4279_v37 }
 0x117   :  { %v4283_v43 = vpop.eup %4282  ;;  %v338_v45 = vadd.f32 %v4530_v22, %v337_v42  ;;  %v482_v46 = vmul.bf16 1065369472, %v4281_v39 }
 0x118   :  { %v4285_v47 = vpop.eup %4284  ;;  %v468_v48 = vadd.bf16 1065369472, %v4283_v43  ;;  %v392_v49 = vpack.c.bf16 %v346_v41, %v343_v40 }
 0x119   :  { %v467_v51 = vadd.bf16 1065369472, %v4285_v47  ;;  %v391_v52 = vpack.c.bf16 %v338_v45, %v335_v44  ;;  %4205 = vmatprep.mubr.msk.bf16.mxu1 %vm548_vm1, %v482_v46 }
 0x11a   :  { %4294 = vrcp.bf16 %v468_v48  ;;  %v4079_v53 = vmul.bf16 3216621497, %v392_v49  ;;  %4206 = vmatmul.mubr.msk.bf16.gmra.mrb[4].mxu1 %vm548_vm1, %v484_v50 }
 0x11b   :  { %4296 = vrcp.bf16 %v467_v51  ;;  %v4078_v54 = vmul.bf16 3216621497, %v391_v52  ;;  %v4187_v55 = vpop.f32.mrb[24].mxu0 }
 0x11c   :  { %4298 = vpow.bf16 %v4079_v53  ;;  %v350_v56 = vpop.f32.mrb[25].mxu0  ;;  %v359_v60 = vadd.f32 %v4187_v55, %v4530_v22 }
 0x11d   :  { %v4287_v57 = vpop.eup %4286  ;;  %4300 = vpow.bf16 %v4078_v54  ;;  %v4188_v58 = vpop.f32.mrb[26].mxu0  ;;  %v351_v0 = vadd.f32 %v4530_v22, %v350_v56  ;;  %v4583_v56 = vld [vmem:[%s5598_s4] ss:$0 sm:$0xff] }
 0x11e   :  { %v4289_v59 = vpop.eup %4288  ;;  %v362_v61 = vadd.f32 %v4188_v58, %v4530_v22  ;;  %v353_v62 = vpop.f32.mrb[27].mxu0  ;;  %v488_v6 = vmul.bf16 1065369472, %v4287_v57 }
 0x11f   :  { %v4291_v63 = vpop.eup %4290  ;;  %v354_v1 = vadd.f32 %v4530_v22, %v353_v62  ;;  %v486_v2 = vmul.bf16 1065369472, %v4289_v59 }
 0x120   :  { %v4293_v3 = vpop.eup %4292  ;;  %v470_v4 = vadd.bf16 1065369472, %v4291_v63  ;;  %v394_v5 = vpack.c.bf16 %v362_v61, %v359_v60 }
 0x121   :  { %v469_v7 = vadd.bf16 1065369472, %v4293_v3  ;;  %v393_v8 = vpack.c.bf16 %v354_v1, %v351_v0  ;;  %4209 = vmatprep.mubr.msk.bf16.mxu1 %vm548_vm1, %v486_v2 }
 0x122   :  { %4302 = vrcp.bf16 %v470_v4  ;;  %v4081_v9 = vmul.bf16 3216621497, %v394_v5  ;;  %4210 = vmatmul.mubr.msk.bf16.gmra.mrb[8].mxu1 %vm548_vm1, %v488_v6 }
 0x123   :  { %4304 = vrcp.bf16 %v469_v7  ;;  %v4080_v10 = vmul.bf16 3216621497, %v393_v8  ;;  %v4191_v11 = vpop.f32.mrb[28].mxu0 }
 0x124   :  { %4306 = vpow.bf16 %v4081_v9  ;;  %v366_v12 = vpop.f32.mrb[29].mxu0  ;;  %v375_v16 = vadd.f32 %v4191_v11, %v4530_v22 }
 0x125   :  { %v4295_v13 = vpop.eup %4294  ;;  %4308 = vpow.bf16 %v4080_v10  ;;  %v4192_v14 = vpop.f32.mrb[30].mxu0  ;;  %v367_v20 = vadd.f32 %v4530_v22, %v366_v12 }
 0x126   :  { %v4297_v15 = vpop.eup %4296  ;;  %v378_v17 = vadd.f32 %v4192_v14, %v4530_v22  ;;  %v369_v18 = vpop.f32.mrb[31].mxu0  ;;  %v492_v27 = vmul.bf16 1065369472, %v4295_v13 }
 0x127   :  { %v4299_v19 = vpop.eup %4298  ;;  %v370_v21 = vadd.f32 %v4530_v22, %v369_v18  ;;  %v490_v23 = vmul.bf16 1065369472, %v4297_v15 }
 0x128   :  { %v4301_v24 = vpop.eup %4300  ;;  %v472_v25 = vadd.bf16 1065369472, %v4299_v19  ;;  %v396_v26 = vpack.c.bf16 %v378_v17, %v375_v16 }
 0x129   :  { %v471_v28 = vadd.bf16 1065369472, %v4301_v24  ;;  %v395_v29 = vpack.c.bf16 %v370_v21, %v367_v20  ;;  %4213 = vmatprep.mubr.msk.bf16.mxu1 %vm548_vm1, %v490_v23 }
 0x12a   :  { %4310 = vrcp.bf16 %v472_v25  ;;  %v4083_v30 = vmul.bf16 3216621497, %v396_v26  ;;  %4214 = vmatmul.mubr.msk.bf16.gmra.mrb[12].mxu1 %vm548_vm1, %v492_v27 }
 0x12b   :  { %4312 = vrcp.bf16 %v471_v28  ;;  %v4082_v31 = vmul.bf16 3216621497, %v395_v29 }
 0x12c   :  { %4314 = vpow.bf16 %v4083_v30 }
 0x12d   :  { %v4303_v32 = vpop.eup %4302  ;;  %4316 = vpow.bf16 %v4082_v31 }
 0x12e   :  { %v4305_v33 = vpop.eup %4304  ;;  %v496_v37 = vmul.bf16 1065369472, %v4303_v32 }
 0x12f   :  { %v4307_v22 = vpop.eup %4306  ;;  %v494_v34 = vmul.bf16 1065369472, %v4305_v33 }
 0x130   :  { %v4309_v35 = vpop.eup %4308  ;;  %v474_v36 = vadd.bf16 1065369472, %v4307_v22 }
 0x131   :  { %v473_v38 = vadd.bf16 1065369472, %v4309_v35  ;;  %4217 = vmatprep.mubr.msk.bf16.mxu1 %vm548_vm1, %v494_v34 }
 0x132   :  { %4318 = vrcp.bf16 %v474_v36  ;;  %4218 = vmatmul.mubr.msk.bf16.gmra.mrb[16].mxu1 %vm548_vm1, %v496_v37 }
 0x133   :  { %4320 = vrcp.bf16 %v473_v38 }
 0x135   :  { %v4311_v39 = vpop.eup %4310 }
 0x136   :  { %v4313_v40 = vpop.eup %4312  ;;  %v500_v45 = vmul.bf16 1065369472, %v4311_v39 }
 0x137   :  { %v4315_v41 = vpop.eup %4314  ;;  %v498_v42 = vmul.bf16 1065369472, %v4313_v40 }
 0x138   :  { %v4317_v43 = vpop.eup %4316  ;;  %v476_v44 = vadd.bf16 1065369472, %v4315_v41 }
 0x139   :  { %v475_v46 = vadd.bf16 1065369472, %v4317_v43  ;;  %4221 = vmatprep.mubr.msk.bf16.mxu1 %vm548_vm1, %v498_v42 }
 0x13a   :  { %4322 = vrcp.bf16 %v476_v44  ;;  %4222 = vmatmul.mubr.msk.bf16.gmra.mrb[20].mxu1 %vm548_vm1, %v500_v45 }
 0x13b   :  { %4324 = vrcp.bf16 %v475_v46 }
 0x13d   :  { %v4319_v47 = vpop.eup %4318 }
 0x13e   :  { %v4321_v48 = vpop.eup %4320  ;;  %v504_v50 = vmul.bf16 1065369472, %v4319_v47 }
 0x13f   :  { %v502_v49 = vmul.bf16 1065369472, %v4321_v48 }
 0x141   :  { %4225 = vmatprep.mubr.msk.bf16.mxu1 %vm548_vm1, %v502_v49 }
 0x142   :  { %4226 = vmatmul.mubr.msk.bf16.gmra.mrb[24].mxu1 %vm548_vm1, %v504_v50 }
 0x145   :  { %v4323_v51 = vpop.eup %4322 }
 0x146   :  { %v4325_v52 = vpop.eup %4324  ;;  %v508_v54 = vmul.bf16 1065369472, %v4323_v51 }
 0x147   :  { %v506_v53 = vmul.bf16 1065369472, %v4325_v52 }
 0x149   :  { %4229 = vmatprep.mubr.msk.bf16.mxu1 %vm548_vm1, %v506_v53 }
 0x14a   :  { %4230 = vmatmul.mubr.msk.bf16.gmra.mrb[28].mxu1 %vm548_vm1, %v508_v54  ;;  %vm3917_vm1 = vcmask 1048512  }
 0x1e5   :  { %v4203_v55 = vpop.f32.mrb[0].mxu1 }
 0x1e6   :  { %v631_v57 = vpop.f32.mrb[1].mxu1  ;;  %v640_v59 = vadd.f32 %v4203_v55, %v4583_v56 }
 0x1e7   :  { %v4204_v58 = vpop.f32.mrb[2].mxu1  ;;  %v632_v62 = vadd.f32 %v4583_v56, %v631_v57 }
 0x1e8   :  { %v643_v60 = vadd.f32 %v4204_v58, %v4583_v56  ;;  %v634_v61 = vpop.f32.mrb[3].mxu1 }
 0x1e9   :  { %v635_v63 = vadd.f32 %v4583_v56, %v634_v61  ;;  %v4608_v61 = vld [vmem:[%s5599_s5] ss:$0 sm:$0xff] }
 0x1ea   :  { %v759_v0 = vpack.c.bf16 %v643_v60, %v640_v59 }
 0x1eb   :  { %v758_v1 = vpack.c.bf16 %v635_v63, %v632_v62 }
 0x1ec   :  { %v4106_v2 = vmul.bf16 3216621497, %v759_v0 }
 0x1ed   :  { %v4105_v3 = vmul.bf16 3216621497, %v758_v1  ;;  %v4207_v4 = vpop.f32.mrb[4].mxu1 }
 0x1ee   :  { %4326 = vpow.bf16 %v4106_v2  ;;  %v647_v5 = vpop.f32.mrb[5].mxu1  ;;  %v656_v7 = vadd.f32 %v4207_v4, %v4583_v56 }
 0x1ef   :  { %4328 = vpow.bf16 %v4105_v3  ;;  %v4208_v6 = vpop.f32.mrb[6].mxu1  ;;  %v648_v10 = vadd.f32 %v4583_v56, %v647_v5 }
 0x1f0   :  { %v659_v8 = vadd.f32 %v4208_v6, %v4583_v56  ;;  %v650_v9 = vpop.f32.mrb[7].mxu1 }
 0x1f1   :  { %v651_v11 = vadd.f32 %v4583_v56, %v650_v9 }
 0x1f2   :  { %v761_v12 = vpack.c.bf16 %v659_v8, %v656_v7 }
 0x1f3   :  { %v760_v13 = vpack.c.bf16 %v651_v11, %v648_v10 }
 0x1f4   :  { %v4108_v14 = vmul.bf16 3216621497, %v761_v12 }
 0x1f5   :  { %v4107_v15 = vmul.bf16 3216621497, %v760_v13  ;;  %v4211_v16 = vpop.f32.mrb[8].mxu1 }
 0x1f6   :  { %4330 = vpow.bf16 %v4108_v14  ;;  %v663_v17 = vpop.f32.mrb[9].mxu1  ;;  %v672_v19 = vadd.f32 %v4211_v16, %v4583_v56 }
 0x1f7   :  { %4332 = vpow.bf16 %v4107_v15  ;;  %v4212_v18 = vpop.f32.mrb[10].mxu1  ;;  %v664_v24 = vadd.f32 %v4583_v56, %v663_v17 }
 0x1f8   :  { %v675_v20 = vadd.f32 %v4212_v18, %v4583_v56  ;;  %v666_v21 = vpop.f32.mrb[11].mxu1 }
 0x1f9   :  { %v4327_v23 = vpop.eup %4326  ;;  %v667_v25 = vadd.f32 %v4583_v56, %v666_v21 }
 0x1fa   :  { %v4329_v26 = vpop.eup %4328  ;;  %v839_v27 = vadd.bf16 1065369472, %v4327_v23  ;;  %v763_v28 = vpack.c.bf16 %v675_v20, %v672_v19 }
 0x1fb   :  { %v838_v29 = vadd.bf16 1065369472, %v4329_v26  ;;  %v762_v30 = vpack.c.bf16 %v667_v25, %v664_v24 }
 0x1fc   :  { %4334 = vrcp.bf16 %v839_v27  ;;  %v4110_v31 = vmul.bf16 3216621497, %v763_v28 }
 0x1fd   :  { %4336 = vrcp.bf16 %v838_v29  ;;  %v4109_v32 = vmul.bf16 3216621497, %v762_v30  ;;  %v4215_v33 = vpop.f32.mrb[12].mxu1 }
 0x1fe   :  { %4338 = vpow.bf16 %v4110_v31  ;;  %v679_v22 = vpop.f32.mrb[13].mxu1  ;;  %v688_v35 = vadd.f32 %v4215_v33, %v4583_v56 }
 0x1ff   :  { %4340 = vpow.bf16 %v4109_v32  ;;  %v4216_v34 = vpop.f32.mrb[14].mxu1  ;;  %v680_v39 = vadd.f32 %v4583_v56, %v679_v22 }
 0x200   :  { %v691_v36 = vadd.f32 %v4216_v34, %v4583_v56  ;;  %v682_v37 = vpop.f32.mrb[15].mxu1 }
 0x201   :  { %v4331_v38 = vpop.eup %4330  ;;  %v683_v40 = vadd.f32 %v4583_v56, %v682_v37 }
 0x202   :  { %v4333_v41 = vpop.eup %4332  ;;  %v841_v42 = vadd.bf16 1065369472, %v4331_v38  ;;  %v765_v43 = vpack.c.bf16 %v691_v36, %v688_v35 }
 0x203   :  { %v840_v44 = vadd.bf16 1065369472, %v4333_v41  ;;  %v764_v45 = vpack.c.bf16 %v683_v40, %v680_v39 }
 0x204   :  { %4342 = vrcp.bf16 %v841_v42  ;;  %v4112_v46 = vmul.bf16 3216621497, %v765_v43 }
 0x205   :  { %4344 = vrcp.bf16 %v840_v44  ;;  %v4111_v47 = vmul.bf16 3216621497, %v764_v45  ;;  %v4219_v48 = vpop.f32.mrb[16].mxu1 }
 0x206   :  { %4346 = vpow.bf16 %v4112_v46  ;;  %v695_v49 = vpop.f32.mrb[17].mxu1  ;;  %v704_v53 = vadd.f32 %v4219_v48, %v4583_v56 }
 0x207   :  { %v4335_v50 = vpop.eup %4334  ;;  %4348 = vpow.bf16 %v4111_v47  ;;  %v4220_v51 = vpop.f32.mrb[18].mxu1  ;;  %v696_v59 = vadd.f32 %v4583_v56, %v695_v49 }
 0x208   :  { %v4337_v52 = vpop.eup %4336  ;;  %v707_v54 = vadd.f32 %v4220_v51, %v4583_v56  ;;  %v698_v55 = vpop.f32.mrb[19].mxu1  ;;  %v857_v57 = vmul.bf16 1065369472, %v4335_v50 }
 0x209   :  { %v4339_v58 = vpop.eup %4338  ;;  %v699_v60 = vadd.f32 %v4583_v56, %v698_v55  ;;  %v855_v62 = vmul.bf16 1065369472, %v4337_v52 }
 0x20a   :  { %v4341_v63 = vpop.eup %4340  ;;  %v843_v0 = vadd.bf16 1065369472, %v4339_v58  ;;  %v767_v1 = vpack.c.bf16 %v707_v54, %v704_v53  ;;  %v888_v2 = vunpack.c.l.bf16 %v857_v57  ;;  %v889_v3 = vunpack.c.h.bf16 %v857_v57 }
 0x20b   :  { %v842_v4 = vadd.bf16 1065369472, %v4341_v63  ;;  %v766_v5 = vpack.c.bf16 %v699_v60, %v696_v59  ;;  %v886_v6 = vunpack.c.l.bf16 %v855_v62  ;;  %v887_v7 = vunpack.c.h.bf16 %v855_v62 }
 0x20c   :  { %4350 = vrcp.bf16 %v843_v0  ;;  %v4114_v8 = vmul.bf16 3216621497, %v767_v1  ;;  %v927_v9 = vmul.f32 %v4608_v61, %v888_v2  ;;  %v928_v10 = vmul.f32 %v4608_v61, %v889_v3 }
 0x20d   :  { %4352 = vrcp.bf16 %v842_v4  ;;  %v4113_v11 = vmul.bf16 3216621497, %v766_v5  ;;  %v4223_v12 = vpop.f32.mrb[20].mxu1  ;;  %v925_v13 = vmul.f32 %v4608_v61, %v886_v6  ;;  %v926_v14 = vmul.f32 %v4608_v61, %v887_v7 }
 0x20e   :  { %4354 = vpow.bf16 %v4114_v8  ;;  %v711_v15 = vpop.f32.mrb[21].mxu1  ;;  %v964_v16 = vsel %vm957_vm2, %v927_v9, 0.0  ;;  %v720_v21 = vadd.f32 %v4223_v12, %v4583_v56  ;;  %v967_v25 = vsel %vm957_vm2, %v928_v10, 0.0 }
 0x20f   :  { %v4343_v17 = vpop.eup %4342  ;;  %4356 = vpow.bf16 %v4113_v11  ;;  %965 = vadd.xlane.f32.xlu1 %v964_v16  ;;  %v4224_v18 = vpop.f32.mrb[22].mxu1  ;;  %v958_v19 = vsel %vm957_vm2, %v925_v13, 0.0  ;;  %v712_v28 = vadd.f32 %v4583_v56, %v711_v15  ;;  %v961_v30 = vsel %vm957_vm2, %v926_v14, 0.0 }
 0x210   :  { %v4345_v20 = vpop.eup %4344  ;;  %v723_v23 = vadd.f32 %v4224_v18, %v4583_v56  ;;  %v714_v24 = vpop.f32.mrb[23].mxu1  ;;  %959 = vadd.xlane.f32.xlu0 %v958_v19  ;;  %v861_v26 = vmul.bf16 1065369472, %v4343_v17 }
 0x211   :  { %v4347_v27 = vpop.eup %4346  ;;  %v715_v29 = vadd.f32 %v4583_v56, %v714_v24  ;;  %v859_v31 = vmul.bf16 1065369472, %v4345_v20 }
 0x212   :  { %v4349_v32 = vpop.eup %4348  ;;  %v845_v33 = vadd.bf16 1065369472, %v4347_v27  ;;  %v769_v22 = vpack.c.bf16 %v723_v23, %v720_v21  ;;  %v893_v34 = vunpack.c.h.bf16 %v861_v26  ;;  %v892_v35 = vunpack.c.l.bf16 %v861_v26 }
 0x213   :  { %v844_v36 = vadd.bf16 1065369472, %v4349_v32  ;;  %v768_v37 = vpack.c.bf16 %v715_v29, %v712_v28  ;;  %968 = vadd.xlane.f32.xlu1 %v967_v25  ;;  %v891_v38 = vunpack.c.h.bf16 %v859_v31  ;;  %v890_v39 = vunpack.c.l.bf16 %v859_v31 }
 0x214   :  { %4358 = vrcp.bf16 %v845_v33  ;;  %v4116_v40 = vmul.bf16 3216621497, %v769_v22  ;;  %962 = vadd.xlane.f32.xlu0 %v961_v30  ;;  %v932_v41 = vmul.f32 %v4608_v61, %v893_v34  ;;  %v931_v42 = vmul.f32 %v4608_v61, %v892_v35 }
 0x215   :  { %4360 = vrcp.bf16 %v844_v36  ;;  %v4115_v43 = vmul.bf16 3216621497, %v768_v37  ;;  %v4227_v44 = vpop.f32.mrb[24].mxu1  ;;  %v930_v45 = vmul.f32 %v4608_v61, %v891_v38  ;;  %v929_v46 = vmul.f32 %v4608_v61, %v890_v39 }
 0x216   :  { %4362 = vpow.bf16 %v4116_v40  ;;  %v727_v47 = vpop.f32.mrb[25].mxu1  ;;  %v979_v48 = vsel %vm957_vm2, %v932_v41, 0.0  ;;  %v976_v49 = vsel %vm957_vm2, %v931_v42, 0.0  ;;  %v736_v53 = vadd.f32 %v4227_v44, %v4583_v56 }
 0x217   :  { %v4351_v50 = vpop.eup %4350  ;;  %4364 = vpow.bf16 %v4115_v43  ;;  %980 = vadd.xlane.f32.xlu1 %v979_v48  ;;  %v4228_v51 = vpop.f32.mrb[26].mxu1  ;;  %v728_v54 = vadd.f32 %v4583_v56, %v727_v47  ;;  %v973_v62 = vsel %vm957_vm2, %v930_v45, 0.0  ;;  %v970_v63 = vsel %vm957_vm2, %v929_v46, 0.0 }
 0x218   :  { %v4353_v52 = vpop.eup %4352  ;;  %v739_v55 = vadd.f32 %v4228_v51, %v4583_v56  ;;  %v730_v57 = vpop.f32.mrb[27].mxu1  ;;  %977 = vadd.xlane.f32.xlu0 %v976_v49  ;;  %v865_v58 = vmul.bf16 1065369472, %v4351_v50 }
 0x219   :  { %v4355_v59 = vpop.eup %4354  ;;  %v731_v60 = vadd.f32 %v4583_v56, %v730_v57  ;;  %v863_v0 = vmul.bf16 1065369472, %v4353_v52 }
 0x21a   :  { %v4357_v1 = vpop.eup %4356  ;;  %v847_v2 = vadd.bf16 1065369472, %v4355_v59  ;;  %v771_v3 = vpack.c.bf16 %v739_v55, %v736_v53  ;;  %v897_v4 = vunpack.c.h.bf16 %v865_v58  ;;  %v896_v5 = vunpack.c.l.bf16 %v865_v58 }
 0x21b   :  { %v846_v6 = vadd.bf16 1065369472, %v4357_v1  ;;  %v770_v7 = vpack.c.bf16 %v731_v60, %v728_v54  ;;  %974 = vadd.xlane.f32.xlu1 %v973_v62  ;;  %v895_v8 = vunpack.c.h.bf16 %v863_v0  ;;  %v894_v9 = vunpack.c.l.bf16 %v863_v0 }
 0x21c   :  { %4366 = vrcp.bf16 %v847_v2  ;;  %v4118_v10 = vmul.bf16 3216621497, %v771_v3  ;;  %971 = vadd.xlane.f32.xlu0 %v970_v63  ;;  %v936_v11 = vmul.f32 %v4608_v61, %v897_v4  ;;  %v935_v12 = vmul.f32 %v4608_v61, %v896_v5 }
 0x21d   :  { %4368 = vrcp.bf16 %v846_v6  ;;  %v4117_v13 = vmul.bf16 3216621497, %v770_v7  ;;  %v4231_v14 = vpop.f32.mrb[28].mxu1  ;;  %v934_v15 = vmul.f32 %v4608_v61, %v895_v8  ;;  %v933_v16 = vmul.f32 %v4608_v61, %v894_v9 }
 0x21e   :  { %4370 = vpow.bf16 %v4118_v10  ;;  %v743_v17 = vpop.f32.mrb[29].mxu1  ;;  %v991_v18 = vsel %vm957_vm2, %v936_v11, 0.0  ;;  %v988_v19 = vsel %vm957_vm2, %v935_v12, 0.0  ;;  %v752_v24 = vadd.f32 %v4231_v14, %v4583_v56 }
 0x21f   :  { %v4359_v20 = vpop.eup %4358  ;;  %4372 = vpow.bf16 %v4117_v13  ;;  %v4232_v21 = vpop.f32.mrb[30].mxu1  ;;  %992 = vadd.xlane.f32.xlu1 %v991_v18  ;;  %v744_v25 = vadd.f32 %v4583_v56, %v743_v17  ;;  %v985_v31 = vsel %vm957_vm2, %v934_v15, 0.0  ;;  %v982_v32 = vsel %vm957_vm2, %v933_v16, 0.0 }
 0x220   :  { %v4361_v23 = vpop.eup %4360  ;;  %v755_v26 = vadd.f32 %v4232_v21, %v4583_v56  ;;  %v746_v27 = vpop.f32.mrb[31].mxu1  ;;  %989 = vadd.xlane.f32.xlu0 %v988_v19  ;;  %v869_v28 = vmul.bf16 1065369472, %v4359_v20  ;;  %v4441_v60 = vmov 0  }
 0x221   :  { %v4363_v29 = vpop.eup %4362  ;;  %v747_v30 = vadd.f32 %v4583_v56, %v746_v27  ;;  %v867_v33 = vmul.bf16 1065369472, %v4361_v23  ;;  %4239 = vset.pattern.permute.xlu1 %v4441_v60  ;;  %4240 = vset.pattern.permute.xlu0 %v4441_v60 }
 0x222   :  { %v4365_v22 = vpop.eup %4364  ;;  %v849_v34 = vadd.bf16 1065369472, %v4363_v29  ;;  %v773_v35 = vpack.c.bf16 %v755_v26, %v752_v24  ;;  %v901_v36 = vunpack.c.h.bf16 %v869_v28  ;;  %v900_v37 = vunpack.c.l.bf16 %v869_v28 }
 0x223   :  { %v848_v38 = vadd.bf16 1065369472, %v4365_v22  ;;  %v772_v39 = vpack.c.bf16 %v747_v30, %v744_v25  ;;  %986 = vadd.xlane.f32.xlu1 %v985_v31  ;;  %v899_v40 = vunpack.c.h.bf16 %v867_v33  ;;  %v898_v41 = vunpack.c.l.bf16 %v867_v33 }
 0x224   :  { %4374 = vrcp.bf16 %v849_v34  ;;  %v4120_v42 = vmul.bf16 3216621497, %v773_v35  ;;  %983 = vadd.xlane.f32.xlu0 %v982_v32  ;;  %v940_v56 = vmul.f32 %v4608_v61, %v901_v36  ;;  %v939_v43 = vmul.f32 %v4608_v61, %v900_v37 }
 0x225   :  { %4376 = vrcp.bf16 %v848_v38  ;;  %v4119_v44 = vmul.bf16 3216621497, %v772_v39  ;;  %v938_v47 = vmul.f32 %v4608_v61, %v899_v40  ;;  %v937_v49 = vmul.f32 %v4608_v61, %v898_v41 }
 0x226   :  { %4378 = vpow.bf16 %v4120_v42  ;;  %v1003_v45 = vsel %vm957_vm2, %v940_v56, 0.0  ;;  %v1000_v46 = vsel %vm957_vm2, %v939_v43, 0.0 }
 0x227   :  { %v4367_v48 = vpop.eup %4366  ;;  %4380 = vpow.bf16 %v4119_v44  ;;  %1004 = vadd.xlane.f32.xlu1 %v1003_v45  ;;  %v997_v57 = vsel %vm957_vm2, %v938_v47, 0.0  ;;  %v994_v63 = vsel %vm957_vm2, %v937_v49, 0.0 }
 0x228   :  { %v4369_v50 = vpop.eup %4368  ;;  %1001 = vadd.xlane.f32.xlu0 %v1000_v46  ;;  %v873_v51 = vmul.bf16 1065369472, %v4367_v48 }
 0x229   :  { %v4371_v52 = vpop.eup %4370  ;;  %v871_v53 = vmul.bf16 1065369472, %v4369_v50 }
 0x22a   :  { %v4373_v54 = vpop.eup %4372  ;;  %v851_v55 = vadd.bf16 1065369472, %v4371_v52  ;;  %v905_v58 = vunpack.c.h.bf16 %v873_v51  ;;  %v904_v59 = vunpack.c.l.bf16 %v873_v51 }
 0x22b   :  { %v850_v62 = vadd.bf16 1065369472, %v4373_v54  ;;  %998 = vadd.xlane.f32.xlu1 %v997_v57  ;;  %v903_v0 = vunpack.c.h.bf16 %v871_v53  ;;  %v902_v1 = vunpack.c.l.bf16 %v871_v53 }
 0x22c   :  { %4382 = vrcp.bf16 %v851_v55  ;;  %995 = vadd.xlane.f32.xlu0 %v994_v63  ;;  %v944_v2 = vmul.f32 %v4608_v61, %v905_v58  ;;  %v943_v3 = vmul.f32 %v4608_v61, %v904_v59  ;;  %v1120_v63 = vlaneseq }
 0x22d   :  { %4384 = vrcp.bf16 %v850_v62  ;;  %v942_v6 = vmul.f32 %v4608_v61, %v903_v0  ;;  %v941_v8 = vmul.f32 %v4608_v61, %v902_v1  ;;  %v4442_v0 = vmov 1966171168  }
 0x22e   :  { %v1015_v4 = vsel %vm957_vm2, %v944_v2, 0.0  ;;  %v1012_v5 = vsel %vm957_vm2, %v943_v3, 0.0  ;;  %v2149_v1 = vunpack.c.l.s4 %v4442_v0  ;;  %v4687_v2 = vshrl.u32 %v1120_v63, 7 }
 0x22f   :  { %v4375_v7 = vpop.eup %4374  ;;  %1016 = vadd.xlane.f32.xlu1 %v1015_v4  ;;  %v1009_v15 = vsel %vm957_vm2, %v942_v6, 0.0  ;;  %v1006_v19 = vsel %vm957_vm2, %v941_v8, 0.0  ;;  %v4692_v3 = vstv %s5600_s6  ;;  %s4443_s6 = smov [#allocation6]  }
 0x230   :  { %v4377_v9 = vpop.eup %4376  ;;  %1013 = vadd.xlane.f32.xlu0 %v1012_v5  ;;  %v877_v10 = vmul.bf16 1065369472, %v4375_v7  ;;  %v2150_v4 = vunpack.c.0.s8 %v2149_v1  ;;  %v4698_v5 = vsub.s32 1, %v4687_v2  ;;  %v4701_v6 = vsub.s32 2, %v4687_v2  ;;  %s4025_s27 = sshll.u32 %s4443_s6, 4  ;;  %s4026_s27 = int_to_ptr.vmem [resolvable:$true] %s4025_s27 }
 0x231   :  { %v4379_v11 = vpop.eup %4378  ;;  %v875_v12 = vmul.bf16 1065369472, %v4377_v9  ;;  %v4704_v7 = vsub.s32 3, %v4687_v2  ;;  %v4707_v9 = vsub.s32 4, %v4687_v2  ;;  %s4412_s28 = scalar_lea.vmem %s4026_s27, 32  ;;  %p4417_p9 = scmp.lt.s32.totalorder %s4026_s27, %s4026_s27 }
 0x232   :  { %v4381_v13 = vpop.eup %4380  ;;  %v853_v14 = vadd.bf16 1065369472, %v4379_v11  ;;  %v909_v16 = vunpack.c.h.bf16 %v877_v10  ;;  %v908_v17 = vunpack.c.l.bf16 %v877_v10  ;;  %v4710_v10 = vsub.s32 5, %v4687_v2  ;;  %p4413_p8 = scmp.ne.s32.totalorder %s4026_s27, %s4412_s28  ;;  %p4418_p10 = scmp.lt.s32.totalorder %s4412_s28, %s4412_s28 }
 0x233   :  { %v852_v18 = vadd.bf16 1065369472, %v4381_v13  ;;  %1010 = vadd.xlane.f32.xlu1 %v1009_v15  ;;  %v907_v20 = vunpack.c.h.bf16 %v875_v12  ;;  %v906_v21 = vunpack.c.l.bf16 %v875_v12  ;;  %v4713_v11 = vsub.s32 6, %v4687_v2 }
 0x234   :  { %4386 = vrcp.bf16 %v853_v14  ;;  %1007 = vadd.xlane.f32.xlu0 %v1006_v19  ;;  %v948_v23 = vmul.f32 %v4608_v61, %v909_v16  ;;  %v947_v24 = vmul.f32 %v4608_v61, %v908_v17  ;;  %v4716_v12 = vsub.s32 7, %v4687_v2  ;;  %p4419_p11 = por %p4418_p10, %p4417_p9 }
 0x235   :  { %4388 = vrcp.bf16 %v852_v18  ;;  %v946_v27 = vmul.f32 %v4608_v61, %v907_v20  ;;  %v945_v29 = vmul.f32 %v4608_v61, %v906_v21  ;;  %v4721_v16 = vsub.s32 %v2150_v4, %v4687_v2 }
 0x236   :  { %v1027_v25 = vsel %vm957_vm2, %v948_v23, 0.0  ;;  %v1024_v26 = vsel %vm957_vm2, %v947_v24, 0.0  ;;  %p4420_p12 = pnand %p4419_p11, %p4413_p8 }
 0x237   :  { %v4383_v28 = vpop.eup %4382  ;;  %1028 = vadd.xlane.f32.xlu1 %v1027_v25  ;;  %v1021_v33 = vsel %vm957_vm2, %v946_v27, 0.0  ;;  %v1018_v35 = vsel %vm957_vm2, %v945_v29, 0.0 }
 0x238   :  { %v4385_v30 = vpop.eup %4384  ;;  %1025 = vadd.xlane.f32.xlu0 %v1024_v26  ;;  %v881_v31 = vmul.bf16 1065369472, %v4383_v28 }
 0x239   :  { %v879_v32 = vmul.bf16 1065369472, %v4385_v30 }
 0x23a   :  { %v913_v22 = vunpack.c.h.bf16 %v881_v31  ;;  %v912_v34 = vunpack.c.l.bf16 %v881_v31 }
 0x23b   :  { %1022 = vadd.xlane.f32.xlu1 %v1021_v33  ;;  %v911_v36 = vunpack.c.h.bf16 %v879_v32  ;;  %v910_v37 = vunpack.c.l.bf16 %v879_v32 }
 0x23c   :  { %1019 = vadd.xlane.f32.xlu0 %v1018_v35  ;;  %v952_v38 = vmul.f32 %v4608_v61, %v913_v22  ;;  %v951_v39 = vmul.f32 %v4608_v61, %v912_v34 }
 0x23d   :  { %v950_v42 = vmul.f32 %v4608_v61, %v911_v36  ;;  %v949_v43 = vmul.f32 %v4608_v61, %v910_v37 }
 0x23e   :  { %v1039_v40 = vsel %vm957_vm2, %v952_v38, 0.0  ;;  %v1036_v41 = vsel %vm957_vm2, %v951_v39, 0.0 }
 0x23f   :  { %v4387_v56 = vpop.eup %4386  ;;  %1040 = vadd.xlane.f32.xlu1 %v1039_v40  ;;  %v1033_v47 = vsel %vm957_vm2, %v950_v42, 0.0  ;;  %v1030_v49 = vsel %vm957_vm2, %v949_v43, 0.0 }
 0x240   :  { %v4389_v44 = vpop.eup %4388  ;;  %1037 = vadd.xlane.f32.xlu0 %v1036_v41  ;;  %v885_v45 = vmul.bf16 1065369472, %v4387_v56 }
 0x241   :  { %v883_v46 = vmul.bf16 1065369472, %v4389_v44 }
 0x242   :  { %v917_v48 = vunpack.c.h.bf16 %v885_v45  ;;  %v916_v52 = vunpack.c.l.bf16 %v885_v45 }
 0x243   :  { %1034 = vadd.xlane.f32.xlu1 %v1033_v47  ;;  %v914_v50 = vunpack.c.l.bf16 %v883_v46  ;;  %v915_v51 = vunpack.c.h.bf16 %v883_v46 }
 0x244   :  { %1031 = vadd.xlane.f32.xlu0 %v1030_v49  ;;  %v956_v53 = vmul.f32 %v4608_v61, %v917_v48  ;;  %v955_v59 = vmul.f32 %v4608_v61, %v916_v52 }
 0x245   :  { %v953_v54 = vmul.f32 %v4608_v61, %v914_v50  ;;  %v954_v57 = vmul.f32 %v4608_v61, %v915_v51  ;;  %v4695_v61 = vsub.s32 0, %v4687_v2 }
 0x246   :  { %v1051_v55 = vsel %vm957_vm2, %v956_v53, 0.0  ;;  %v1048_v62 = vsel %vm957_vm2, %v955_v59, 0.0 }
 0x247   :  { %1052 = vadd.xlane.f32.xlu1 %v1051_v55  ;;  %v1042_v58 = vsel %vm957_vm2, %v953_v54, 0.0  ;;  %v1045_v60 = vsel %vm957_vm2, %v954_v57, 0.0  ;;  %vm4016_vm2 = vcmp.lt.s32.totalorder %v1120_v63, 256 }
 0x248   :  { %1043 = vadd.xlane.f32.xlu0 %v1042_v58 }
 0x24b   :  { %1046 = vadd.xlane.f32.xlu1 %v1045_v60 }
 0x24c   :  { %1049 = vadd.xlane.f32.xlu0 %v1048_v62 }
 0x29c   :  { %v966_v8 = vpop.xlane.xlu1 %965 }
 0x29d   :  { %v1058_v13 = vadd.f32 %v4692_v3, %v966_v8  ;;  %v960_v14 = vpop.xlane.xlu0 %959 }
 0x29e   :  { %v1056_v15 = vadd.f32 %v4692_v3, %v960_v14 }
 0x29f   :  { %v1187_v17 = vrot.slane %v1058_v13, %v4695_v61  ;;  %v1191_v18 = vrot.slane %v1058_v13, %v4698_v5  ;;  %v1195_v19 = vrot.slane %v1058_v13, %v4701_v6  ;;  %v1199_v20 = vrot.slane %v1058_v13, %v4704_v7 }
 0x2a0   :  { %v969_v21 = vpop.xlane.xlu1 %968  ;;  %v1203_v23 = vrot.slane %v1058_v13, %v4707_v9  ;;  %v1207_v24 = vrot.slane %v1058_v13, %v4710_v10  ;;  %v1211_v25 = vrot.slane %v1058_v13, %v4713_v11  ;;  %v1215_v26 = vrot.slane %v1058_v13, %v4716_v12 }
 0x2a1   :  { %v1059_v27 = vadd.f32 %v4692_v3, %v969_v21  ;;  %v963_v28 = vpop.xlane.xlu0 %962  ;;  %v2242_v29 = vcombine.low %v1187_v17, %v1191_v18  ;;  %v2243_v30 = vcombine.low %v1195_v19, %v1199_v20  ;;  %v1123_v31 = vrot.slane %v1056_v15, %v4695_v61 }
 0x2a2   :  { %v4734_v32 = vadd.f32 %v4692_v3, %v963_v28  ;;  %v2244_v33 = vcombine.low %v1203_v23, %v1207_v24  ;;  %v2245_v22 = vcombine.low %v1211_v25, %v1215_v26  ;;  %v1127_v34 = vrot.slane %v1056_v15, %v4698_v5 }
 0x2a3   :  { %v2252_v35 = vrot.slane %v2242_v29, %v4721_v16  ;;  %v2259_v36 = vrot.slane %v2243_v30, %v4721_v16  ;;  %v1131_v37 = vrot.slane %v1056_v15, %v4701_v6  ;;  %v1135_v38 = vrot.slane %v1056_v15, %v4704_v7 }
 0x2a4   :  { %v981_v39 = vpop.xlane.xlu1 %980  ;;  %v2266_v40 = vrot.slane %v2244_v33, %v4721_v16  ;;  %v2273_v41 = vrot.slane %v2245_v22, %v4721_v16  ;;  %v1139_v42 = vrot.slane %v1056_v15, %v4707_v9  ;;  %v1143_v56 = vrot.slane %v1056_v15, %v4710_v10 }
 0x2a5   :  { %v4746_v43 = vadd.f32 %v4692_v3, %v981_v39  ;;  %v978_v44 = vpop.xlane.xlu0 %977  ;;  %v2274_v45 = vcombine.low %v2252_v35, %v2259_v36  ;;  %v1147_v46 = vrot.slane %v1056_v15, %v4713_v11  ;;  %v1151_v47 = vrot.slane %v1056_v15, %v4716_v12 }
 0x2a6   :  { %v4751_v48 = vadd.f32 %v4692_v3, %v978_v44  ;;  %v2275_v49 = vcombine.low %v2266_v40, %v2273_v41  ;;  %v2144_v50 = vcombine.low %v1123_v31, %v1127_v34  ;;  %v2145_v51 = vcombine.low %v1131_v37, %v1135_v38 }
 0x2a7   :  { %v2282_v52 = vrot.slane %v2274_v45, %v4721_v16  ;;  %v2146_v53 = vcombine.low %v1139_v42, %v1143_v56  ;;  %v2147_v54 = vcombine.low %v1147_v46, %v1151_v47  ;;  %v1219_v55 = vrot.slane %v1059_v27, %v4695_v61 }
 0x2a8   :  { %v975_v57 = vpop.xlane.xlu1 %974  ;;  %v2289_v58 = vrot.slane %v2275_v49, %v4721_v16  ;;  %v2154_v59 = vrot.slane %v2144_v50, %v4721_v16  ;;  %v2161_v60 = vrot.slane %v2145_v51, %v4721_v16  ;;  %v1223_v62 = vrot.slane %v1059_v27, %v4698_v5 }
 0x2a9   :  { %v4760_v0 = vadd.f32 %v4692_v3, %v975_v57  ;;  %v972_v1 = vpop.xlane.xlu0 %971  ;;  %v2168_v4 = vrot.slane %v2146_v53, %v4721_v16  ;;  %v2175_v8 = vrot.slane %v2147_v54, %v4721_v16  ;;  %v1227_v13 = vrot.slane %v1059_v27, %v4701_v6 }
 0x2aa   :  { %v4766_v14 = vadd.f32 %v4692_v3, %v972_v1  ;;  %v2290_v15 = vcombine.low %v2282_v52, %v2289_v58  ;;  %v2176_v17 = vcombine.low %v2154_v59, %v2161_v60  ;;  %v1231_v18 = vrot.slane %v1059_v27, %v4704_v7 }
 0x2ab   :  { %v2177_v19 = vcombine.low %v2168_v4, %v2175_v8  ;;  %v1235_v20 = vrot.slane %v1059_v27, %v4707_v9  ;;  %v1239_v21 = vrot.slane %v1059_v27, %v4710_v10  ;;  %v1243_v23 = vrot.slane %v1059_v27, %v4713_v11 }
 0x2ac   :  { %3719 = vperm.xlu1 %4239, %v2290_v15   ;;  %v993_v24 = vpop.xlane.xlu1 %992  ;;  %v2184_v25 = vrot.slane %v2176_v17, %v4721_v16  ;;  %v1247_v26 = vrot.slane %v1059_v27, %v4716_v12  ;;  %v2291_v28 = vcombine.low %v1219_v55, %v1223_v62  ;;  %v2292_v29 = vcombine.low %v1227_v13, %v1231_v18 }
 0x2ad   :  { %v4775_v30 = vadd.f32 %v4692_v3, %v993_v24  ;;  %v2191_v31 = vrot.slane %v2177_v19, %v4721_v16  ;;  %v990_v33 = vpop.xlane.xlu0 %989  ;;  %v2293_v22 = vcombine.low %v1235_v20, %v1239_v21  ;;  %v1155_v34 = vrot.slane %v4734_v32, %v4695_v61 }
 0x2ae   :  { %v4781_v35 = vadd.f32 %v4692_v3, %v990_v33  ;;  %v2294_v36 = vcombine.low %v1243_v23, %v1247_v26  ;;  %v2301_v37 = vrot.slane %v2291_v28, %v4721_v16  ;;  %v2308_v27 = vrot.slane %v2292_v29, %v4721_v16 }
 0x2af   :  { %v2192_v38 = vcombine.low %v2184_v25, %v2191_v31  ;;  %v2315_v39 = vrot.slane %v2293_v22, %v4721_v16  ;;  %v1159_v40 = vrot.slane %v4734_v32, %v4698_v5  ;;  %v1163_v41 = vrot.slane %v4734_v32, %v4701_v6 }
 0x2b0   :  { %v2322_v42 = vrot.slane %v2294_v36, %v4721_v16  ;;  %v2323_v56 = vcombine.low %v2301_v37, %v2308_v27  ;;  %v987_v44 = vpop.xlane.xlu1 %986  ;;  %v1167_v45 = vrot.slane %v4734_v32, %v4704_v7  ;;  %v1171_v46 = vrot.slane %v4734_v32, %v4707_v9 }
 0x2b1   :  { %3713 = vperm.xlu0 %4240, %v2192_v38   ;;  %v4796_v47 = vadd.f32 %v4692_v3, %v987_v44  ;;  %v984_v49 = vpop.xlane.xlu0 %983  ;;  %v1175_v50 = vrot.slane %v4734_v32, %v4710_v10  ;;  %v1179_v51 = vrot.slane %v4734_v32, %v4713_v11  ;;  %v1183_v52 = vrot.slane %v4734_v32, %v4716_v12 }
 0x2b2   :  { %v2324_v53 = vcombine.low %v2315_v39, %v2322_v42  ;;  %v2331_v54 = vrot.slane %v2323_v56, %v4721_v16  ;;  %v4806_v55 = vadd.f32 %v4692_v3, %v984_v49  ;;  %v2193_v57 = vcombine.low %v1155_v34, %v1159_v40 }
 0x2b3   :  { %v2194_v58 = vcombine.low %v1163_v41, %v1167_v45  ;;  %v2195_v59 = vcombine.low %v1171_v46, %v1175_v50  ;;  %v2196_v60 = vcombine.low %v1179_v51, %v1183_v52  ;;  %v1315_v62 = vrot.slane %v4751_v48, %v4695_v61 }
 0x2b4   :  { %v2338_v1 = vrot.slane %v2324_v53, %v4721_v16  ;;  %v2203_v4 = vrot.slane %v2193_v57, %v4721_v16  ;;  %v1005_v8 = vpop.xlane.xlu1 %1004  ;;  %v1319_v32 = vrot.slane %v4751_v48, %v4698_v5  ;;  %v1323_v13 = vrot.slane %v4751_v48, %v4701_v6 }
 0x2b5   :  { %v2210_v15 = vrot.slane %v2194_v58, %v4721_v16  ;;  %v2217_v17 = vrot.slane %v2195_v59, %v4721_v16  ;;  %v2224_v18 = vrot.slane %v2196_v60, %v4721_v16  ;;  %v4820_v19 = vadd.f32 %v4692_v3, %v1005_v8  ;;  %v1002_v20 = vpop.xlane.xlu0 %1001 }
 0x2b6   :  { %v2339_v21 = vcombine.low %v2331_v54, %v2338_v1  ;;  %v4823_v23 = vadd.f32 %v4692_v3, %v1002_v20  ;;  %v1327_v24 = vrot.slane %v4751_v48, %v4704_v7  ;;  %v1331_v25 = vrot.slane %v4751_v48, %v4707_v9 }
 0x2b7   :  { %v2225_v26 = vcombine.low %v2203_v4, %v2210_v15  ;;  %v2226_v28 = vcombine.low %v2217_v17, %v2224_v18  ;;  %v1335_v29 = vrot.slane %v4751_v48, %v4710_v10  ;;  %v1339_v31 = vrot.slane %v4751_v48, %v4713_v11 }
 0x2b8   :  { %3722 = vperm.xlu1 %4239, %v2339_v21   ;;  %v1343_v33 = vrot.slane %v4751_v48, %v4716_v12  ;;  %v2438_v22 = vcombine.low %v1315_v62, %v1319_v32  ;;  %v2439_v34 = vcombine.low %v1323_v13, %v1327_v24  ;;  %v999_v36 = vpop.xlane.xlu1 %998  ;;  %v1347_v37 = vrot.slane %v4746_v43, %v4695_v61 }
 0x2b9   :  { %v2233_v27 = vrot.slane %v2225_v26, %v4721_v16  ;;  %v2240_v38 = vrot.slane %v2226_v28, %v4721_v16  ;;  %v2440_v39 = vcombine.low %v1331_v25, %v1335_v29  ;;  %v4840_v40 = vadd.f32 %v4692_v3, %v999_v36  ;;  %v996_v41 = vpop.xlane.xlu0 %995 }
 0x2ba   :  { %v2441_v42 = vcombine.low %v1339_v31, %v1343_v33  ;;  %v2448_v56 = vrot.slane %v2438_v22, %v4721_v16  ;;  %v2455_v48 = vrot.slane %v2439_v34, %v4721_v16  ;;  %v4845_v44 = vadd.f32 %v4692_v3, %v996_v41 }
 0x2bb   :  { %v2241_v45 = vcombine.low %v2233_v27, %v2240_v38  ;;  %v2462_v46 = vrot.slane %v2440_v39, %v4721_v16  ;;  %v1351_v49 = vrot.slane %v4746_v43, %v4698_v5  ;;  %v1355_v50 = vrot.slane %v4746_v43, %v4701_v6 }
 0x2bc   :  { %v2469_v51 = vrot.slane %v2441_v42, %v4721_v16  ;;  %v2470_v52 = vcombine.low %v2448_v56, %v2455_v48  ;;  %v1359_v53 = vrot.slane %v4746_v43, %v4704_v7  ;;  %v1363_v54 = vrot.slane %v4746_v43, %v4707_v9  ;;  %v1017_v57 = vpop.xlane.xlu1 %1016 }
 0x2bd   :  { %3716 = vperm.xlu1 %4239, %v2241_v45   ;;  %v1367_v58 = vrot.slane %v4746_v43, %v4710_v10  ;;  %v1371_v59 = vrot.slane %v4746_v43, %v4713_v11  ;;  %v1375_v60 = vrot.slane %v4746_v43, %v4716_v12  ;;  %v2487_v62 = vcombine.low %v1347_v37, %v1351_v49  ;;  %v1014_v1 = vpop.xlane.xlu0 %1013 }
 0x2be   :  { %v2471_v4 = vcombine.low %v2462_v46, %v2469_v51  ;;  %v2478_v8 = vrot.slane %v2470_v52, %v4721_v16  ;;  %v2488_v32 = vcombine.low %v1355_v50, %v1359_v53  ;;  %v4865_v13 = vadd.f32 %v4692_v3, %v1017_v57 }
 0x2bf   :  { %v2489_v15 = vcombine.low %v1363_v54, %v1367_v58  ;;  %v2490_v17 = vcombine.low %v1371_v59, %v1375_v60  ;;  %v2497_v18 = vrot.slane %v2487_v62, %v4721_v16  ;;  %v4869_v20 = vadd.f32 %v4692_v3, %v1014_v1 }
 0x2c0   :  { %v2485_v21 = vrot.slane %v2471_v4, %v4721_v16  ;;  %v2504_v43 = vrot.slane %v2488_v32, %v4721_v16  ;;  %v1411_v24 = vrot.slane %v4796_v47, %v4695_v61  ;;  %v1415_v25 = vrot.slane %v4796_v47, %v4698_v5  ;;  %v1011_v54 = vpop.xlane.xlu1 %1010 }
 0x2c1   :  { %v2511_v26 = vrot.slane %v2489_v15, %v4721_v16  ;;  %v2518_v28 = vrot.slane %v2490_v17, %v4721_v16  ;;  %v1419_v29 = vrot.slane %v4796_v47, %v4701_v6  ;;  %v1423_v31 = vrot.slane %v4796_v47, %v4704_v7  ;;  %v1008_v57 = vpop.xlane.xlu0 %1007 }
 0x2c2   :  { %v2486_v33 = vcombine.low %v2478_v8, %v2485_v21  ;;  %v2519_v22 = vcombine.low %v2497_v18, %v2504_v43  ;;  %v1427_v34 = vrot.slane %v4796_v47, %v4707_v9  ;;  %v1431_v36 = vrot.slane %v4796_v47, %v4710_v10 }
 0x2c3   :  { %v2520_v37 = vcombine.low %v2511_v26, %v2518_v28  ;;  %v1435_v27 = vrot.slane %v4796_v47, %v4713_v11  ;;  %v1439_v38 = vrot.slane %v4796_v47, %v4716_v12  ;;  %v2585_v39 = vcombine.low %v1411_v24, %v1415_v25 }
 0x2c4   :  { %3731 = vperm.xlu1 %4239, %v2486_v33   ;;  %v2527_v41 = vrot.slane %v2519_v22, %v4721_v16  ;;  %v2586_v42 = vcombine.low %v1419_v29, %v1423_v31  ;;  %v2587_v56 = vcombine.low %v1427_v34, %v1431_v36  ;;  %v1251_v48 = vrot.slane %v4766_v14, %v4695_v61 }
 0x2c5   :  { %v2534_v45 = vrot.slane %v2520_v37, %v4721_v16  ;;  %v2588_v46 = vcombine.low %v1435_v27, %v1439_v38  ;;  %v2595_v49 = vrot.slane %v2585_v39, %v4721_v16  ;;  %v1255_v50 = vrot.slane %v4766_v14, %v4698_v5  ;;  %v1029_v37 = vpop.xlane.xlu1 %1028  ;;  %v1026_v27 = vpop.xlane.xlu0 %1025 }
 0x2c6   :  { %v2602_v51 = vrot.slane %v2586_v42, %v4721_v16  ;;  %v2609_v47 = vrot.slane %v2587_v56, %v4721_v16  ;;  %v1259_v52 = vrot.slane %v4766_v14, %v4701_v6  ;;  %v1263_v53 = vrot.slane %v4766_v14, %v4704_v7 }
 0x2c7   :  { %v2535_v58 = vcombine.low %v2527_v41, %v2534_v45  ;;  %v2616_v59 = vrot.slane %v2588_v46, %v4721_v16  ;;  %v1267_v60 = vrot.slane %v4766_v14, %v4707_v9  ;;  %v1271_v62 = vrot.slane %v4766_v14, %v4710_v10 }
 0x2c8   :  { %v2617_v1 = vcombine.low %v2595_v49, %v2602_v51  ;;  %v1275_v4 = vrot.slane %v4766_v14, %v4713_v11  ;;  %v1279_v8 = vrot.slane %v4766_v14, %v4716_v12  ;;  %v2340_v32 = vcombine.low %v1251_v48, %v1255_v50 }
 0x2c9   :  { %3734 = vperm.xlu1 %4239, %v2535_v58   ;;  %v2618_v15 = vcombine.low %v2609_v47, %v2616_v59  ;;  %v2341_v17 = vcombine.low %v1259_v52, %v1263_v53  ;;  %v2342_v18 = vcombine.low %v1267_v60, %v1271_v62  ;;  %v4914_v21 = vadd.f32 %v4692_v3, %v1011_v54 }
 0x2ca   :  { %v2625_v43 = vrot.slane %v2617_v1, %v4721_v16  ;;  %v2343_v24 = vcombine.low %v1275_v4, %v1279_v8  ;;  %v2350_v25 = vrot.slane %v2340_v32, %v4721_v16  ;;  %v4919_v26 = vadd.f32 %v4692_v3, %v1008_v57  ;;  %v1023_v32 = vpop.xlane.xlu1 %1022 }
 0x2cb   :  { %v2632_v28 = vrot.slane %v2618_v15, %v4721_v16  ;;  %v2357_v14 = vrot.slane %v2341_v17, %v4721_v16  ;;  %v2364_v29 = vrot.slane %v2342_v18, %v4721_v16  ;;  %v1283_v31 = vrot.slane %v4760_v0, %v4695_v61  ;;  %v1020_v15 = vpop.xlane.xlu0 %1019 }
 0x2cc   :  { %v2371_v33 = vrot.slane %v2343_v24, %v4721_v16  ;;  %v1287_v22 = vrot.slane %v4760_v0, %v4698_v5  ;;  %v1291_v34 = vrot.slane %v4760_v0, %v4701_v6  ;;  %v1295_v36 = vrot.slane %v4760_v0, %v4704_v7 }
 0x2cd   :  { %v2633_v38 = vcombine.low %v2625_v43, %v2632_v28  ;;  %v2372_v39 = vcombine.low %v2350_v25, %v2357_v14  ;;  %v1299_v41 = vrot.slane %v4760_v0, %v4707_v9  ;;  %v1303_v42 = vrot.slane %v4760_v0, %v4710_v10 }
 0x2ce   :  { %v2373_v56 = vcombine.low %v2364_v29, %v2371_v33  ;;  %v1307_v48 = vrot.slane %v4760_v0, %v4713_v11  ;;  %v1311_v45 = vrot.slane %v4760_v0, %v4716_v12  ;;  %v2389_v46 = vcombine.low %v1283_v31, %v1287_v22 }
 0x2cf   :  { %3740 = vperm.xlu0 %4240, %v2633_v38   ;;  %v2380_v49 = vrot.slane %v2372_v39, %v4721_v16  ;;  %v2390_v50 = vcombine.low %v1291_v34, %v1295_v36  ;;  %v2391_v51 = vcombine.low %v1299_v41, %v1303_v42  ;;  %v4943_v47 = vadd.f32 %v4692_v3, %v1029_v37 }
 0x2d0   :  { %v2387_v52 = vrot.slane %v2373_v56, %v4721_v16  ;;  %v2392_v53 = vcombine.low %v1307_v48, %v1311_v45  ;;  %v2399_v54 = vrot.slane %v2389_v46, %v4721_v16  ;;  %v4948_v57 = vadd.f32 %v4692_v3, %v1026_v27 }
 0x2d1   :  { %v2406_v58 = vrot.slane %v2390_v50, %v4721_v16  ;;  %v2413_v0 = vrot.slane %v2391_v51, %v4721_v16  ;;  %v1443_v59 = vrot.slane %v4781_v35, %v4695_v61  ;;  %v1447_v60 = vrot.slane %v4781_v35, %v4698_v5 }
 0x2d2   :  { %v2388_v62 = vcombine.low %v2380_v49, %v2387_v52  ;;  %v2420_v1 = vrot.slane %v2392_v53, %v4721_v16  ;;  %v1451_v4 = vrot.slane %v4781_v35, %v4701_v6  ;;  %v1455_v8 = vrot.slane %v4781_v35, %v4704_v7 }
 0x2d3   :  { %v2421_v17 = vcombine.low %v2399_v54, %v2406_v58  ;;  %v1459_v18 = vrot.slane %v4781_v35, %v4707_v9  ;;  %v1463_v43 = vrot.slane %v4781_v35, %v4710_v10  ;;  %v1467_v24 = vrot.slane %v4781_v35, %v4713_v11 }
 0x2d4   :  { %3725 = vperm.xlu1 %4239, %v2388_v62   ;;  %v2422_v25 = vcombine.low %v2413_v0, %v2420_v1  ;;  %v1471_v28 = vrot.slane %v4781_v35, %v4716_v12  ;;  %v2634_v14 = vcombine.low %v1443_v59, %v1447_v60  ;;  %v2635_v29 = vcombine.low %v1451_v4, %v1455_v8 }
 0x2d5   :  { %v2429_v31 = vrot.slane %v2421_v17, %v4721_v16  ;;  %v2636_v33 = vcombine.low %v1459_v18, %v1463_v43  ;;  %v4971_v22 = vadd.f32 %v4692_v3, %v1023_v32  ;;  %v4974_v34 = vadd.f32 %v4692_v3, %v1020_v15 }
 0x2d6   :  { %v2436_v36 = vrot.slane %v2422_v25, %v4721_v16  ;;  %v2637_v37 = vcombine.low %v1467_v24, %v1471_v28  ;;  %v2644_v27 = vrot.slane %v2634_v14, %v4721_v16  ;;  %v2651_v38 = vrot.slane %v2635_v29, %v4721_v16  ;;  %v1041_v24 = vpop.xlane.xlu1 %1040  ;;  %v1038_v25 = vpop.xlane.xlu0 %1037 }
 0x2d7   :  { %v2658_v35 = vrot.slane %v2636_v33, %v4721_v16  ;;  %v1731_v39 = vrot.slane %v4865_v13, %v4695_v61  ;;  %v1735_v41 = vrot.slane %v4865_v13, %v4698_v5  ;;  %v1739_v42 = vrot.slane %v4865_v13, %v4701_v6 }
 0x2d8   :  { %v2437_v56 = vcombine.low %v2429_v31, %v2436_v36  ;;  %v2665_v48 = vrot.slane %v2637_v37, %v4721_v16  ;;  %v2666_v45 = vcombine.low %v2644_v27, %v2651_v38  ;;  %v1743_v46 = vrot.slane %v4865_v13, %v4704_v7 }
 0x2d9   :  { %v1747_v49 = vrot.slane %v4865_v13, %v4707_v9  ;;  %v1751_v50 = vrot.slane %v4865_v13, %v4710_v10  ;;  %v1755_v51 = vrot.slane %v4865_v13, %v4713_v11  ;;  %v1759_v52 = vrot.slane %v4865_v13, %v4716_v12 }
 0x2da   :  { %3728 = vperm.xlu1 %4239, %v2437_v56   ;;  %v2667_v53 = vcombine.low %v2658_v35, %v2665_v48  ;;  %v2674_v54 = vrot.slane %v2666_v45, %v4721_v16  ;;  %v3075_v58 = vcombine.low %v1731_v39, %v1735_v41  ;;  %v3076_v0 = vcombine.low %v1739_v42, %v1743_v46 }
 0x2db   :  { %v3077_v59 = vcombine.low %v1747_v49, %v1751_v50  ;;  %v3078_v60 = vcombine.low %v1755_v51, %v1759_v52  ;;  %v1475_v62 = vrot.slane %v4775_v30, %v4695_v61  ;;  %v1479_v1 = vrot.slane %v4775_v30, %v4698_v5 }
 0x2dc   :  { %v2681_v4 = vrot.slane %v2667_v53, %v4721_v16  ;;  %v3085_v8 = vrot.slane %v3075_v58, %v4721_v16  ;;  %v3092_v13 = vrot.slane %v3076_v0, %v4721_v16  ;;  %v1483_v32 = vrot.slane %v4775_v30, %v4701_v6 }
 0x2dd   :  { %v3099_v15 = vrot.slane %v3077_v59, %v4721_v16  ;;  %v3106_v17 = vrot.slane %v3078_v60, %v4721_v16  ;;  %v1487_v18 = vrot.slane %v4775_v30, %v4704_v7  ;;  %v1491_v43 = vrot.slane %v4775_v30, %v4707_v9 }
 0x2de   :  { %v2682_v28 = vcombine.low %v2674_v54, %v2681_v4  ;;  %v3107_v14 = vcombine.low %v3085_v8, %v3092_v13  ;;  %v1495_v29 = vrot.slane %v4775_v30, %v4710_v10  ;;  %v1499_v31 = vrot.slane %v4775_v30, %v4713_v11 }
 0x2df   :  { %v3108_v33 = vcombine.low %v3099_v15, %v3106_v17  ;;  %v1503_v36 = vrot.slane %v4775_v30, %v4716_v12  ;;  %v2683_v37 = vcombine.low %v1475_v62, %v1479_v1  ;;  %v2684_v27 = vcombine.low %v1483_v32, %v1487_v18 }
 0x2e0   :  { %3743 = vperm.xlu1 %4239, %v2682_v28   ;;  %v3115_v38 = vrot.slane %v3107_v14, %v4721_v16  ;;  %v2685_v35 = vcombine.low %v1491_v43, %v1495_v29  ;;  %v5021_v39 = vadd.f32 %v4692_v3, %v1041_v24  ;;  %v5024_v41 = vadd.f32 %v4692_v3, %v1038_v25 }
 0x2e1   :  { %v3122_v42 = vrot.slane %v3108_v33, %v4721_v16  ;;  %v2686_v56 = vcombine.low %v1499_v31, %v1503_v36  ;;  %v2693_v48 = vrot.slane %v2683_v37, %v4721_v16  ;;  %v2700_v45 = vrot.slane %v2684_v27, %v4721_v16  ;;  %v1035_v31 = vpop.xlane.xlu1 %1034  ;;  %v1032_v33 = vpop.xlane.xlu0 %1031 }
 0x2e2   :  { %v2707_v30 = vrot.slane %v2685_v35, %v4721_v16  ;;  %v1667_v46 = vrot.slane %v4914_v21, %v4695_v61  ;;  %v1671_v49 = vrot.slane %v4914_v21, %v4698_v5  ;;  %v1675_v50 = vrot.slane %v4914_v21, %v4701_v6 }
 0x2e3   :  { %v3123_v51 = vcombine.low %v3115_v38, %v3122_v42  ;;  %v2714_v52 = vrot.slane %v2686_v56, %v4721_v16  ;;  %v2715_v53 = vcombine.low %v2693_v48, %v2700_v45  ;;  %v1679_v54 = vrot.slane %v4914_v21, %v4704_v7 }
 0x2e4   :  { %v1683_v58 = vrot.slane %v4914_v21, %v4707_v9  ;;  %v1687_v0 = vrot.slane %v4914_v21, %v4710_v10  ;;  %v1691_v59 = vrot.slane %v4914_v21, %v4713_v11  ;;  %v1695_v60 = vrot.slane %v4914_v21, %v4716_v12 }
 0x2e5   :  { %3770 = vperm.xlu0 %4240, %v3123_v51   ;;  %v2716_v62 = vcombine.low %v2707_v30, %v2714_v52  ;;  %v2723_v1 = vrot.slane %v2715_v53, %v4721_v16  ;;  %v2977_v4 = vcombine.low %v1667_v46, %v1671_v49  ;;  %v2978_v8 = vcombine.low %v1675_v50, %v1679_v54 }
 0x2e6   :  { %v2979_v13 = vcombine.low %v1683_v58, %v1687_v0  ;;  %v2980_v32 = vcombine.low %v1691_v59, %v1695_v60  ;;  %v1379_v15 = vrot.slane %v4806_v55, %v4695_v61  ;;  %v1383_v17 = vrot.slane %v4806_v55, %v4698_v5 }
 0x2e7   :  { %v2730_v18 = vrot.slane %v2716_v62, %v4721_v16  ;;  %v2987_v43 = vrot.slane %v2977_v4, %v4721_v16  ;;  %v2994_v21 = vrot.slane %v2978_v8, %v4721_v16  ;;  %v1387_v24 = vrot.slane %v4806_v55, %v4701_v6 }
 0x2e8   :  { %v3001_v25 = vrot.slane %v2979_v13, %v4721_v16  ;;  %v3008_v28 = vrot.slane %v2980_v32, %v4721_v16  ;;  %v1391_v14 = vrot.slane %v4806_v55, %v4704_v7  ;;  %v1395_v29 = vrot.slane %v4806_v55, %v4707_v9 }
 0x2e9   :  { %v2731_v36 = vcombine.low %v2723_v1, %v2730_v18  ;;  %v3009_v37 = vcombine.low %v2987_v43, %v2994_v21  ;;  %v1399_v27 = vrot.slane %v4806_v55, %v4710_v10  ;;  %v1403_v38 = vrot.slane %v4806_v55, %v4713_v11 }
 0x2ea   :  { %v3010_v35 = vcombine.low %v3001_v25, %v3008_v28  ;;  %v1407_v42 = vrot.slane %v4806_v55, %v4716_v12  ;;  %v2536_v56 = vcombine.low %v1379_v15, %v1383_v17  ;;  %v2537_v48 = vcombine.low %v1387_v24, %v1391_v14 }
 0x2eb   :  { %3746 = vperm.xlu1 %4239, %v2731_v36   ;;  %v3017_v45 = vrot.slane %v3009_v37, %v4721_v16  ;;  %v2538_v30 = vcombine.low %v1395_v29, %v1399_v27  ;;  %v5071_v46 = vadd.f32 %v4692_v3, %v1035_v31  ;;  %v5074_v49 = vadd.f32 %v4692_v3, %v1032_v33 }
 0x2ec   :  { %v3024_v50 = vrot.slane %v3010_v35, %v4721_v16  ;;  %v2539_v51 = vcombine.low %v1403_v38, %v1407_v42  ;;  %v2546_v52 = vrot.slane %v2536_v56, %v4721_v16  ;;  %v2553_v53 = vrot.slane %v2537_v48, %v4721_v16  ;;  %v1053_v38 = vpop.xlane.xlu1 %1052  ;;  %v1044_v35 = vpop.xlane.xlu0 %1043 }
 0x2ed   :  { %v2560_v55 = vrot.slane %v2538_v30, %v4721_v16  ;;  %v1859_v54 = vrot.slane %v4943_v47, %v4695_v61  ;;  %v1863_v58 = vrot.slane %v4943_v47, %v4698_v5  ;;  %v1867_v0 = vrot.slane %v4943_v47, %v4701_v6 }
 0x2ee   :  { %v3025_v59 = vcombine.low %v3017_v45, %v3024_v50  ;;  %v2567_v60 = vrot.slane %v2539_v51, %v4721_v16  ;;  %v2568_v62 = vcombine.low %v2546_v52, %v2553_v53  ;;  %v1871_v1 = vrot.slane %v4943_v47, %v4704_v7 }
 0x2ef   :  { %v1875_v4 = vrot.slane %v4943_v47, %v4707_v9  ;;  %v1879_v8 = vrot.slane %v4943_v47, %v4710_v10  ;;  %v1883_v13 = vrot.slane %v4943_v47, %v4713_v11  ;;  %v1887_v32 = vrot.slane %v4943_v47, %v4716_v12 }
 0x2f0   :  { %3764 = vperm.xlu0 %4240, %v3025_v59   ;;  %v2569_v15 = vcombine.low %v2560_v55, %v2567_v60  ;;  %v2576_v17 = vrot.slane %v2568_v62, %v4721_v16  ;;  %v3271_v18 = vcombine.low %v1859_v54, %v1863_v58  ;;  %v3272_v43 = vcombine.low %v1867_v0, %v1871_v1 }
 0x2f1   :  { %v3273_v21 = vcombine.low %v1875_v4, %v1879_v8  ;;  %v3274_v24 = vcombine.low %v1883_v13, %v1887_v32  ;;  %v1507_v25 = vrot.slane %v4845_v44, %v4695_v61  ;;  %v1511_v28 = vrot.slane %v4845_v44, %v4698_v5 }
 0x2f2   :  { %v2583_v14 = vrot.slane %v2569_v15, %v4721_v16  ;;  %v3281_v29 = vrot.slane %v3271_v18, %v4721_v16  ;;  %v3288_v47 = vrot.slane %v3272_v43, %v4721_v16  ;;  %v1515_v31 = vrot.slane %v4845_v44, %v4701_v6 }
 0x2f3   :  { %v3295_v33 = vrot.slane %v3273_v21, %v4721_v16  ;;  %v3302_v36 = vrot.slane %v3274_v24, %v4721_v16  ;;  %v1519_v37 = vrot.slane %v4845_v44, %v4704_v7  ;;  %v1523_v27 = vrot.slane %v4845_v44, %v4707_v9 }
 0x2f4   :  { %v2584_v42 = vcombine.low %v2576_v17, %v2583_v14  ;;  %v3303_v56 = vcombine.low %v3281_v29, %v3288_v47  ;;  %v1527_v48 = vrot.slane %v4845_v44, %v4710_v10  ;;  %v1531_v45 = vrot.slane %v4845_v44, %v4713_v11 }
 0x2f5   :  { %v3304_v30 = vcombine.low %v3295_v33, %v3302_v36  ;;  %v1535_v50 = vrot.slane %v4845_v44, %v4716_v12  ;;  %v2732_v51 = vcombine.low %v1507_v25, %v1511_v28  ;;  %v2733_v52 = vcombine.low %v1515_v31, %v1519_v37 }
 0x2f6   :  { %3737 = vperm.xlu1 %4239, %v2584_v42   ;;  %v3311_v53 = vrot.slane %v3303_v56, %v4721_v16  ;;  %v2734_v55 = vcombine.low %v1523_v27, %v1527_v48  ;;  %v5121_v54 = vadd.f32 %v4692_v3, %v1053_v38  ;;  %v5124_v58 = vadd.f32 %v4692_v3, %v1044_v35 }
 0x2f7   :  { %v3318_v0 = vrot.slane %v3304_v30, %v4721_v16  ;;  %v2735_v59 = vcombine.low %v1531_v45, %v1535_v50  ;;  %v2742_v60 = vrot.slane %v2732_v51, %v4721_v16  ;;  %v2749_v62 = vrot.slane %v2733_v52, %v4721_v16  ;;  %v1047_v45 = vpop.xlane.xlu1 %1046  ;;  %v1050_v30 = vpop.xlane.xlu0 %1049 }
 0x2f8   :  { %v2756_v44 = vrot.slane %v2734_v55, %v4721_v16  ;;  %v1795_v1 = vrot.slane %v4971_v22, %v4695_v61  ;;  %v1799_v4 = vrot.slane %v4971_v22, %v4698_v5  ;;  %v1803_v8 = vrot.slane %v4971_v22, %v4701_v6 }
 0x2f9   :  { %v3319_v13 = vcombine.low %v3311_v53, %v3318_v0  ;;  %v2763_v32 = vrot.slane %v2735_v59, %v4721_v16  ;;  %v2764_v15 = vcombine.low %v2742_v60, %v2749_v62  ;;  %v1807_v17 = vrot.slane %v4971_v22, %v4704_v7 }
 0x2fa   :  { %v1811_v18 = vrot.slane %v4971_v22, %v4707_v9  ;;  %v1815_v43 = vrot.slane %v4971_v22, %v4710_v10  ;;  %v1819_v21 = vrot.slane %v4971_v22, %v4713_v11  ;;  %v1823_v24 = vrot.slane %v4971_v22, %v4716_v12 }
 0x2fb   :  { %3782 = vperm.xlu0 %4240, %v3319_v13   ;;  %v2765_v25 = vcombine.low %v2756_v44, %v2763_v32  ;;  %v2772_v28 = vrot.slane %v2764_v15, %v4721_v16  ;;  %v3173_v14 = vcombine.low %v1795_v1, %v1799_v4  ;;  %v3174_v29 = vcombine.low %v1803_v8, %v1807_v17 }
 0x2fc   :  { %v3175_v47 = vcombine.low %v1811_v18, %v1815_v43  ;;  %v3176_v31 = vcombine.low %v1819_v21, %v1823_v24  ;;  %v1539_v33 = vrot.slane %v4840_v40, %v4695_v61  ;;  %v1543_v36 = vrot.slane %v4840_v40, %v4698_v5 }
 0x2fd   :  { %v2779_v37 = vrot.slane %v2765_v25, %v4721_v16  ;;  %v3183_v27 = vrot.slane %v3173_v14, %v4721_v16  ;;  %v3190_v22 = vrot.slane %v3174_v29, %v4721_v16  ;;  %v1547_v38 = vrot.slane %v4840_v40, %v4701_v6 }
 0x2fe   :  { %v3197_v35 = vrot.slane %v3175_v47, %v4721_v16  ;;  %v3204_v42 = vrot.slane %v3176_v31, %v4721_v16  ;;  %v1551_v56 = vrot.slane %v4840_v40, %v4704_v7  ;;  %v1555_v48 = vrot.slane %v4840_v40, %v4707_v9 }
 0x2ff   :  { %v2780_v50 = vcombine.low %v2772_v28, %v2779_v37  ;;  %v3205_v51 = vcombine.low %v3183_v27, %v3190_v22  ;;  %v1559_v52 = vrot.slane %v4840_v40, %v4710_v10  ;;  %v1563_v53 = vrot.slane %v4840_v40, %v4713_v11 }
 0x300   :  { %v3206_v55 = vcombine.low %v3197_v35, %v3204_v42  ;;  %v1567_v0 = vrot.slane %v4840_v40, %v4716_v12  ;;  %v2781_v59 = vcombine.low %v1539_v33, %v1543_v36  ;;  %v2782_v60 = vcombine.low %v1547_v38, %v1551_v56 }
 0x301   :  { %3749 = vperm.xlu1 %4239, %v2780_v50   ;;  %v3213_v62 = vrot.slane %v3205_v51, %v4721_v16  ;;  %v2783_v44 = vcombine.low %v1555_v48, %v1559_v52  ;;  %v5171_v1 = vadd.f32 %v4692_v3, %v1047_v45  ;;  %v5174_v4 = vadd.f32 %v4692_v3, %v1050_v30 }
 0x302   :  { %v3220_v8 = vrot.slane %v3206_v55, %v4721_v16  ;;  %v2784_v13 = vcombine.low %v1563_v53, %v1567_v0  ;;  %v2791_v32 = vrot.slane %v2781_v59, %v4721_v16  ;;  %v2798_v15 = vrot.slane %v2782_v60, %v4721_v16 }
 0x303   :  { %v2805_v40 = vrot.slane %v2783_v44, %v4721_v16  ;;  %v1699_v17 = vrot.slane %v4869_v20, %v4695_v61  ;;  %v1703_v18 = vrot.slane %v4869_v20, %v4698_v5  ;;  %v1707_v43 = vrot.slane %v4869_v20, %v4701_v6 }
 0x304   :  { %v3221_v3 = vcombine.low %v3213_v62, %v3220_v8  ;;  %v2812_v21 = vrot.slane %v2784_v13, %v4721_v16  ;;  %v2813_v24 = vcombine.low %v2791_v32, %v2798_v15  ;;  %v1711_v25 = vrot.slane %v4869_v20, %v4704_v7 }
 0x305   :  { %v1715_v28 = vrot.slane %v4869_v20, %v4707_v9  ;;  %v1719_v14 = vrot.slane %v4869_v20, %v4710_v10  ;;  %v1723_v29 = vrot.slane %v4869_v20, %v4713_v11  ;;  %v1727_v47 = vrot.slane %v4869_v20, %v4716_v12 }
 0x306   :  { %3776 = vperm.xlu0 %4240, %v3221_v3   ;;  %v2814_v31 = vcombine.low %v2805_v40, %v2812_v21  ;;  %v2821_v33 = vrot.slane %v2813_v24, %v4721_v16  ;;  %v3026_v36 = vcombine.low %v1699_v17, %v1703_v18  ;;  %v3027_v37 = vcombine.low %v1707_v43, %v1711_v25 }
 0x307   :  { %v3028_v27 = vcombine.low %v1715_v28, %v1719_v14  ;;  %v3029_v22 = vcombine.low %v1723_v29, %v1727_v47  ;;  %v1955_v38 = vrot.slane %v5024_v41, %v4695_v61  ;;  %v1959_v35 = vrot.slane %v5024_v41, %v4698_v5 }
 0x308   :  { %v2828_v42 = vrot.slane %v2814_v31, %v4721_v16  ;;  %v3036_v56 = vrot.slane %v3026_v36, %v4721_v16  ;;  %v3043_v20 = vrot.slane %v3027_v37, %v4721_v16  ;;  %v1963_v48 = vrot.slane %v5024_v41, %v4701_v6 }
 0x309   :  { %v3050_v45 = vrot.slane %v3028_v27, %v4721_v16  ;;  %v3057_v30 = vrot.slane %v3029_v22, %v4721_v16  ;;  %v1967_v50 = vrot.slane %v5024_v41, %v4704_v7  ;;  %v1971_v51 = vrot.slane %v5024_v41, %v4707_v9 }
 0x30a   :  { %v2829_v52 = vcombine.low %v2821_v33, %v2828_v42  ;;  %v3058_v53 = vcombine.low %v3036_v56, %v3043_v20  ;;  %v1975_v55 = vrot.slane %v5024_v41, %v4710_v10  ;;  %v1979_v0 = vrot.slane %v5024_v41, %v4713_v11 }
 0x30b   :  { %v3059_v59 = vcombine.low %v3050_v45, %v3057_v30  ;;  %v1983_v60 = vrot.slane %v5024_v41, %v4716_v12  ;;  %v3418_v62 = vcombine.low %v1955_v38, %v1959_v35  ;;  %v3419_v44 = vcombine.low %v1963_v48, %v1967_v50 }
 0x30c   :  { %3752 = vperm.xlu1 %4239, %v2829_v52   ;;  %v3066_v8 = vrot.slane %v3058_v53, %v4721_v16  ;;  %v3420_v13 = vcombine.low %v1971_v51, %v1975_v55  ;;  %v1635_v32 = vrot.slane %v4919_v26, %v4695_v61  ;;  %v1639_v15 = vrot.slane %v4919_v26, %v4698_v5 }
 0x30d   :  { %v3073_v40 = vrot.slane %v3059_v59, %v4721_v16  ;;  %v3421_v17 = vcombine.low %v1979_v0, %v1983_v60  ;;  %v3428_v18 = vrot.slane %v3418_v62, %v4721_v16  ;;  %v3435_v43 = vrot.slane %v3419_v44, %v4721_v16 }
 0x30e   :  { %v3442_v41 = vrot.slane %v3420_v13, %v4721_v16  ;;  %v1643_v3 = vrot.slane %v4919_v26, %v4701_v6  ;;  %v1647_v21 = vrot.slane %v4919_v26, %v4704_v7  ;;  %v1651_v24 = vrot.slane %v4919_v26, %v4707_v9 }
 0x30f   :  { %v3074_v25 = vcombine.low %v3066_v8, %v3073_v40  ;;  %v3449_v28 = vrot.slane %v3421_v17, %v4721_v16  ;;  %v3450_v14 = vcombine.low %v3428_v18, %v3435_v43  ;;  %v1655_v29 = vrot.slane %v4919_v26, %v4710_v10 }
 0x310   :  { %v1659_v47 = vrot.slane %v4919_v26, %v4713_v11  ;;  %v1663_v31 = vrot.slane %v4919_v26, %v4716_v12  ;;  %v2928_v33 = vcombine.low %v1635_v32, %v1639_v15  ;;  %v2929_v36 = vcombine.low %v1643_v3, %v1647_v21 }
 0x311   :  { %3767 = vperm.xlu1 %4239, %v3074_v25   ;;  %v3451_v37 = vcombine.low %v3442_v41, %v3449_v28  ;;  %v3458_v27 = vrot.slane %v3450_v14, %v4721_v16  ;;  %v2930_v22 = vcombine.low %v1651_v24, %v1655_v29  ;;  %v1987_v38 = vrot.slane %v5021_v39, %v4695_v61 }
 0x312   :  { %v2931_v35 = vcombine.low %v1659_v47, %v1663_v31  ;;  %v2938_v42 = vrot.slane %v2928_v33, %v4721_v16  ;;  %v2945_v56 = vrot.slane %v2929_v36, %v4721_v16  ;;  %v1991_v20 = vrot.slane %v5021_v39, %v4698_v5 }
 0x313   :  { %v3465_v26 = vrot.slane %v3451_v37, %v4721_v16  ;;  %v2952_v48 = vrot.slane %v2930_v22, %v4721_v16  ;;  %v1995_v45 = vrot.slane %v5021_v39, %v4701_v6  ;;  %v1999_v30 = vrot.slane %v5021_v39, %v4704_v7 }
 0x314   :  { %v2959_v50 = vrot.slane %v2931_v35, %v4721_v16  ;;  %v2960_v51 = vcombine.low %v2938_v42, %v2945_v56  ;;  %v2003_v52 = vrot.slane %v5021_v39, %v4707_v9  ;;  %v2007_v53 = vrot.slane %v5021_v39, %v4710_v10 }
 0x315   :  { %v3466_v55 = vcombine.low %v3458_v27, %v3465_v26  ;;  %v2011_v0 = vrot.slane %v5021_v39, %v4713_v11  ;;  %v2015_v59 = vrot.slane %v5021_v39, %v4716_v12  ;;  %v3467_v60 = vcombine.low %v1987_v38, %v1991_v20 }
 0x316   :  { %v2961_v62 = vcombine.low %v2952_v48, %v2959_v50  ;;  %v2968_v44 = vrot.slane %v2960_v51, %v4721_v16  ;;  %v3468_v8 = vcombine.low %v1995_v45, %v1999_v30  ;;  %v3469_v13 = vcombine.low %v2003_v52, %v2007_v53 }
 0x317   :  { %3791 = vperm.xlu0 %4240, %v3466_v55   ;;  %v3470_v32 = vcombine.low %v2011_v0, %v2015_v59  ;;  %v3477_v15 = vrot.slane %v3467_v60, %v4721_v16  ;;  %v1827_v40 = vrot.slane %v4948_v57, %v4695_v61  ;;  %v1831_v17 = vrot.slane %v4948_v57, %v4698_v5 }
 0x318   :  { %v2975_v18 = vrot.slane %v2961_v62, %v4721_v16  ;;  %v3484_v39 = vrot.slane %v3468_v8, %v4721_v16  ;;  %v3491_v43 = vrot.slane %v3469_v13, %v4721_v16  ;;  %v1835_v41 = vrot.slane %v4948_v57, %v4701_v6 }
 0x319   :  { %v3498_v3 = vrot.slane %v3470_v32, %v4721_v16  ;;  %v1839_v21 = vrot.slane %v4948_v57, %v4704_v7  ;;  %v1843_v24 = vrot.slane %v4948_v57, %v4707_v9  ;;  %v1847_v25 = vrot.slane %v4948_v57, %v4710_v10 }
 0x31a   :  { %v2976_v28 = vcombine.low %v2968_v44, %v2975_v18  ;;  %v3499_v14 = vcombine.low %v3477_v15, %v3484_v39  ;;  %v1851_v29 = vrot.slane %v4948_v57, %v4713_v11  ;;  %v1855_v47 = vrot.slane %v4948_v57, %v4716_v12 }
 0x31b   :  { %v3500_v31 = vcombine.low %v3491_v43, %v3498_v3  ;;  %v3222_v33 = vcombine.low %v1827_v40, %v1831_v17  ;;  %v3223_v36 = vcombine.low %v1835_v41, %v1839_v21  ;;  %v3224_v37 = vcombine.low %v1843_v24, %v1847_v25 }
 0x31c   :  { %3761 = vperm.xlu1 %4239, %v2976_v28   ;;  %v3507_v27 = vrot.slane %v3499_v14, %v4721_v16  ;;  %v3225_v22 = vcombine.low %v1851_v29, %v1855_v47  ;;  %v1923_v38 = vrot.slane %v5071_v46, %v4695_v61  ;;  %v1927_v35 = vrot.slane %v5071_v46, %v4698_v5 }
 0x31d   :  { %v3514_v42 = vrot.slane %v3500_v31, %v4721_v16  ;;  %v3232_v56 = vrot.slane %v3222_v33, %v4721_v16  ;;  %v3239_v57 = vrot.slane %v3223_v36, %v4721_v16  ;;  %v3246_v20 = vrot.slane %v3224_v37, %v4721_v16 }
 0x31e   :  { %v3253_v26 = vrot.slane %v3225_v22, %v4721_v16  ;;  %v1931_v48 = vrot.slane %v5071_v46, %v4701_v6  ;;  %v1935_v45 = vrot.slane %v5071_v46, %v4704_v7  ;;  %v1939_v30 = vrot.slane %v5071_v46, %v4707_v9 }
 0x31f   :  { %v3515_v50 = vcombine.low %v3507_v27, %v3514_v42  ;;  %v3254_v51 = vcombine.low %v3232_v56, %v3239_v57  ;;  %v1943_v52 = vrot.slane %v5071_v46, %v4710_v10  ;;  %v1947_v53 = vrot.slane %v5071_v46, %v4713_v11 }
 0x320   :  { %v3255_v55 = vcombine.low %v3246_v20, %v3253_v26  ;;  %v1951_v0 = vrot.slane %v5071_v46, %v4716_v12  ;;  %v3369_v59 = vcombine.low %v1923_v38, %v1927_v35  ;;  %v3370_v60 = vcombine.low %v1931_v48, %v1935_v45 }
 0x321   :  { %3794 = vperm.xlu0 %4240, %v3515_v50   ;;  %v3262_v62 = vrot.slane %v3254_v51, %v4721_v16  ;;  %v3371_v44 = vcombine.low %v1939_v30, %v1943_v52  ;;  %v1763_v8 = vrot.slane %v4974_v34, %v4695_v61  ;;  %v1767_v13 = vrot.slane %v4974_v34, %v4698_v5 }
 0x322   :  { %v3269_v32 = vrot.slane %v3255_v55, %v4721_v16  ;;  %v3372_v15 = vcombine.low %v1947_v53, %v1951_v0  ;;  %v3379_v40 = vrot.slane %v3369_v59, %v4721_v16  ;;  %v3386_v17 = vrot.slane %v3370_v60, %v4721_v16 }
 0x323   :  { %v3393_v46 = vrot.slane %v3371_v44, %v4721_v16  ;;  %v1771_v18 = vrot.slane %v4974_v34, %v4701_v6  ;;  %v1775_v39 = vrot.slane %v4974_v34, %v4704_v7  ;;  %v1779_v43 = vrot.slane %v4974_v34, %v4707_v9 }
 0x324   :  { %v3270_v41 = vcombine.low %v3262_v62, %v3269_v32  ;;  %v3400_v3 = vrot.slane %v3372_v15, %v4721_v16  ;;  %v3401_v21 = vcombine.low %v3379_v40, %v3386_v17  ;;  %v1783_v24 = vrot.slane %v4974_v34, %v4710_v10 }
 0x325   :  { %v1787_v25 = vrot.slane %v4974_v34, %v4713_v11  ;;  %v1791_v28 = vrot.slane %v4974_v34, %v4716_v12  ;;  %v3124_v14 = vcombine.low %v1763_v8, %v1767_v13  ;;  %v3125_v29 = vcombine.low %v1771_v18, %v1775_v39 }
 0x326   :  { %3779 = vperm.xlu1 %4239, %v3270_v41   ;;  %v3402_v47 = vcombine.low %v3393_v46, %v3400_v3  ;;  %v3409_v31 = vrot.slane %v3401_v21, %v4721_v16  ;;  %v3126_v33 = vcombine.low %v1779_v43, %v1783_v24  ;;  %v2083_v36 = vrot.slane %v5174_v4, %v4695_v61 }
 0x327   :  { %v3127_v37 = vcombine.low %v1787_v25, %v1791_v28  ;;  %v3134_v27 = vrot.slane %v3124_v14, %v4721_v16  ;;  %v3141_v22 = vrot.slane %v3125_v29, %v4721_v16  ;;  %v2087_v38 = vrot.slane %v5174_v4, %v4698_v5 }
 0x328   :  { %v3416_v34 = vrot.slane %v3402_v47, %v4721_v16  ;;  %v3148_v35 = vrot.slane %v3126_v33, %v4721_v16  ;;  %v2091_v42 = vrot.slane %v5174_v4, %v4701_v6  ;;  %v2095_v56 = vrot.slane %v5174_v4, %v4704_v7 }
 0x329   :  { %v3155_v57 = vrot.slane %v3127_v37, %v4721_v16  ;;  %v3156_v20 = vcombine.low %v3134_v27, %v3141_v22  ;;  %v2099_v26 = vrot.slane %v5174_v4, %v4707_v9  ;;  %v2103_v48 = vrot.slane %v5174_v4, %v4710_v10 }
 0x32a   :  { %v3417_v45 = vcombine.low %v3409_v31, %v3416_v34  ;;  %v2107_v30 = vrot.slane %v5174_v4, %v4713_v11  ;;  %v2111_v50 = vrot.slane %v5174_v4, %v4716_v12  ;;  %v3614_v51 = vcombine.low %v2083_v36, %v2087_v38 }
 0x32b   :  { %v3157_v52 = vcombine.low %v3148_v35, %v3155_v57  ;;  %v3164_v53 = vrot.slane %v3156_v20, %v4721_v16  ;;  %v3615_v55 = vcombine.low %v2091_v42, %v2095_v56  ;;  %v3616_v0 = vcombine.low %v2099_v26, %v2103_v48 }
 0x32c   :  { %3788 = vperm.xlu0 %4240, %v3417_v45   ;;  %v3617_v59 = vcombine.low %v2107_v30, %v2111_v50  ;;  %v3624_v60 = vrot.slane %v3614_v51, %v4721_v16  ;;  %v1891_v62 = vrot.slane %v5074_v49, %v4695_v61  ;;  %v1895_v44 = vrot.slane %v5074_v49, %v4698_v5 }
 0x32d   :  { %v3171_v8 = vrot.slane %v3157_v52, %v4721_v16  ;;  %v3631_v4 = vrot.slane %v3615_v55, %v4721_v16  ;;  %v3638_v13 = vrot.slane %v3616_v0, %v4721_v16  ;;  %v1899_v32 = vrot.slane %v5074_v49, %v4701_v6 }
 0x32e   :  { %v3645_v15 = vrot.slane %v3617_v59, %v4721_v16  ;;  %v1903_v40 = vrot.slane %v5074_v49, %v4704_v7  ;;  %v1907_v17 = vrot.slane %v5074_v49, %v4707_v9  ;;  %v1911_v46 = vrot.slane %v5074_v49, %v4710_v10 }
 0x32f   :  { %v3172_v18 = vcombine.low %v3164_v53, %v3171_v8  ;;  %v3646_v39 = vcombine.low %v3624_v60, %v3631_v4  ;;  %v1915_v43 = vrot.slane %v5074_v49, %v4713_v11  ;;  %v1919_v41 = vrot.slane %v5074_v49, %v4716_v12 }
 0x330   :  { %v3647_v3 = vcombine.low %v3638_v13, %v3645_v15  ;;  %v3320_v21 = vcombine.low %v1891_v62, %v1895_v44  ;;  %v3321_v24 = vcombine.low %v1899_v32, %v1903_v40  ;;  %v3322_v25 = vcombine.low %v1907_v17, %v1911_v46 }
 0x331   :  { %3773 = vperm.xlu1 %4239, %v3172_v18   ;;  %v3654_v28 = vrot.slane %v3646_v39, %v4721_v16  ;;  %v3323_v14 = vcombine.low %v1915_v43, %v1919_v41  ;;  %v2019_v29 = vrot.slane %v5124_v58, %v4695_v61  ;;  %v2023_v47 = vrot.slane %v5124_v58, %v4698_v5 }
 0x332   :  { %v3661_v31 = vrot.slane %v3647_v3, %v4721_v16  ;;  %v3330_v33 = vrot.slane %v3320_v21, %v4721_v16  ;;  %v3337_v49 = vrot.slane %v3321_v24, %v4721_v16  ;;  %v3344_v36 = vrot.slane %v3322_v25, %v4721_v16 }
 0x333   :  { %v3351_v37 = vrot.slane %v3323_v14, %v4721_v16  ;;  %v2027_v27 = vrot.slane %v5124_v58, %v4701_v6  ;;  %v2031_v22 = vrot.slane %v5124_v58, %v4704_v7  ;;  %v2035_v38 = vrot.slane %v5124_v58, %v4707_v9 }
 0x334   :  { %v3662_v34 = vcombine.low %v3654_v28, %v3661_v31  ;;  %v3352_v35 = vcombine.low %v3330_v33, %v3337_v49  ;;  %v2039_v42 = vrot.slane %v5124_v58, %v4710_v10  ;;  %v2043_v56 = vrot.slane %v5124_v58, %v4713_v11 }
 0x335   :  { %v3353_v57 = vcombine.low %v3344_v36, %v3351_v37  ;;  %v2047_v20 = vrot.slane %v5124_v58, %v4716_v12  ;;  %v3516_v26 = vcombine.low %v2019_v29, %v2023_v47  ;;  %v3517_v48 = vcombine.low %v2027_v27, %v2031_v22 }
 0x336   :  { %3803 = vperm.xlu0 %4240, %v3662_v34   ;;  %v3360_v45 = vrot.slane %v3352_v35, %v4721_v16  ;;  %v3518_v30 = vcombine.low %v2035_v38, %v2039_v42  ;;  %v1571_v50 = vrot.slane %v4823_v23, %v4695_v61  ;;  %v1575_v51 = vrot.slane %v4823_v23, %v4698_v5 }
 0x337   :  { %v3367_v52 = vrot.slane %v3353_v57, %v4721_v16  ;;  %v3519_v53 = vcombine.low %v2043_v56, %v2047_v20  ;;  %v3526_v55 = vrot.slane %v3516_v26, %v4721_v16  ;;  %v3533_v0 = vrot.slane %v3517_v48, %v4721_v16 }
 0x338   :  { %v3540_v58 = vrot.slane %v3518_v30, %v4721_v16  ;;  %v1579_v59 = vrot.slane %v4823_v23, %v4701_v6  ;;  %v1583_v60 = vrot.slane %v4823_v23, %v4704_v7  ;;  %v1587_v62 = vrot.slane %v4823_v23, %v4707_v9 }
 0x339   :  { %v3368_v44 = vcombine.low %v3360_v45, %v3367_v52  ;;  %v3547_v8 = vrot.slane %v3519_v53, %v4721_v16  ;;  %v3548_v4 = vcombine.low %v3526_v55, %v3533_v0  ;;  %v1591_v13 = vrot.slane %v4823_v23, %v4710_v10 }
 0x33a   :  { %v1595_v32 = vrot.slane %v4823_v23, %v4713_v11  ;;  %v1599_v15 = vrot.slane %v4823_v23, %v4716_v12  ;;  %v2830_v40 = vcombine.low %v1571_v50, %v1575_v51  ;;  %v2831_v17 = vcombine.low %v1579_v59, %v1583_v60 }
 0x33b   :  { %3785 = vperm.xlu1 %4239, %v3368_v44   ;;  %v3549_v46 = vcombine.low %v3540_v58, %v3547_v8  ;;  %v3556_v18 = vrot.slane %v3548_v4, %v4721_v16  ;;  %v2832_v39 = vcombine.low %v1587_v62, %v1591_v13  ;;  %v2051_v43 = vrot.slane %v5171_v1, %v4695_v61 }
 0x33c   :  { %v2833_v41 = vcombine.low %v1595_v32, %v1599_v15  ;;  %v2840_v3 = vrot.slane %v2830_v40, %v4721_v16  ;;  %v2847_v21 = vrot.slane %v2831_v17, %v4721_v16  ;;  %v2055_v24 = vrot.slane %v5171_v1, %v4698_v5 }
 0x33d   :  { %v3563_v23 = vrot.slane %v3549_v46, %v4721_v16  ;;  %v2854_v25 = vrot.slane %v2832_v39, %v4721_v16  ;;  %v2059_v28 = vrot.slane %v5171_v1, %v4701_v6  ;;  %v2063_v14 = vrot.slane %v5171_v1, %v4704_v7 }
 0x33e   :  { %v2861_v29 = vrot.slane %v2833_v41, %v4721_v16  ;;  %v2862_v47 = vcombine.low %v2840_v3, %v2847_v21  ;;  %v2067_v31 = vrot.slane %v5171_v1, %v4707_v9  ;;  %v2071_v33 = vrot.slane %v5171_v1, %v4710_v10 }
 0x33f   :  { %v3564_v49 = vcombine.low %v3556_v18, %v3563_v23  ;;  %v2075_v36 = vrot.slane %v5171_v1, %v4713_v11  ;;  %v2079_v37 = vrot.slane %v5171_v1, %v4716_v12  ;;  %v3565_v27 = vcombine.low %v2051_v43, %v2055_v24 }
 0x340   :  { %v2863_v22 = vcombine.low %v2854_v25, %v2861_v29  ;;  %v2870_v38 = vrot.slane %v2862_v47, %v4721_v16  ;;  %v3566_v34 = vcombine.low %v2059_v28, %v2063_v14  ;;  %v3567_v35 = vcombine.low %v2067_v31, %v2071_v33 }
 0x341   :  { %3797 = vperm.xlu0 %4240, %v3564_v49   ;;  %v3568_v42 = vcombine.low %v2075_v36, %v2079_v37  ;;  %v3575_v56 = vrot.slane %v3565_v27, %v4721_v16  ;;  %v1603_v57 = vrot.slane %v4820_v19, %v4695_v61  ;;  %v1607_v20 = vrot.slane %v4820_v19, %v4698_v5  ;;  %v3720_v36 = vpop.permute.xlu1 %3719 }
 0x342   :  { %v2877_v26 = vrot.slane %v2863_v22, %v4721_v16  ;;  %v3582_v1 = vrot.slane %v3566_v34, %v4721_v16  ;;  %v3589_v48 = vrot.slane %v3567_v35, %v4721_v16  ;;  %v1611_v45 = vrot.slane %v4820_v19, %v4701_v6 }
 0x343   :  { %v3596_v30 = vrot.slane %v3568_v42, %v4721_v16  ;;  %v1615_v50 = vrot.slane %v4820_v19, %v4704_v7  ;;  %v1619_v51 = vrot.slane %v4820_v19, %v4707_v9  ;;  %v1623_v52 = vrot.slane %v4820_v19, %v4710_v10 }
 0x344   :  { %v2878_v53 = vcombine.low %v2870_v38, %v2877_v26  ;;  %v3597_v55 = vcombine.low %v3575_v56, %v3582_v1  ;;  %v1627_v0 = vrot.slane %v4820_v19, %v4713_v11  ;;  %v1631_v58 = vrot.slane %v4820_v19, %v4716_v12 }
 0x345   :  { %v3598_v59 = vcombine.low %v3589_v48, %v3596_v30  ;;  %v2879_v60 = vcombine.low %v1603_v57, %v1607_v20  ;;  %v2880_v62 = vcombine.low %v1611_v45, %v1615_v50  ;;  %v2881_v44 = vcombine.low %v1619_v51, %v1623_v52  ;;  %v5491_v37 = vpop.permute.xlu1 %3722  ;;  %v3714_v20 = vpop.permute.xlu0 %3713 }
 0x346   :  { %3755 = vperm.xlu1 %4239, %v2878_v53   ;;  %v3605_v8 = vrot.slane %v3597_v55, %v4721_v16  ;;  %v2882_v4 = vcombine.low %v1627_v0, %v1631_v58  ;;  %v2115_v13 = vrot.slane %v5121_v54, %v4695_v61  ;;  %v2119_v32 = vrot.slane %v5121_v54, %v4698_v5 }
 0x347   :  { %v3612_v15 = vrot.slane %v3598_v59, %v4721_v16  ;;  %v2889_v40 = vrot.slane %v2879_v60, %v4721_v16  ;;  %v2896_v19 = vrot.slane %v2880_v62, %v4721_v16  ;;  %v2903_v17 = vrot.slane %v2881_v44, %v4721_v16 }
 0x348   :  { %v2910_v46 = vrot.slane %v2882_v4, %v4721_v16  ;;  %v2123_v18 = vrot.slane %v5121_v54, %v4701_v6  ;;  %v2127_v39 = vrot.slane %v5121_v54, %v4704_v7  ;;  %v2131_v61 = vrot.slane %v5121_v54, %v4707_v9 }
 0x349   :  { %v3613_v5 = vcombine.low %v3605_v8, %v3612_v15  ;;  %v2911_v43 = vcombine.low %v2889_v40, %v2896_v19  ;;  %v2135_v41 = vrot.slane %v5121_v54, %v4710_v10  ;;  %v2139_v3 = vrot.slane %v5121_v54, %v4713_v11  ;;  %v3717_v27 = vpop.permute.xlu1 %3716 }
 0x34a   :  { %v2912_v21 = vcombine.low %v2903_v17, %v2910_v46  ;;  %v2143_v24 = vrot.slane %v5121_v54, %v4716_v12  ;;  %v3663_v23 = vcombine.low %v2115_v13, %v2119_v32  ;;  %v3664_v6 = vcombine.low %v2123_v18, %v2127_v39 }
 0x34b   :  { %3800 = vperm.xlu0 %4240, %v3613_v5   ;;  %v2919_v7 = vrot.slane %v2911_v43, %v4721_v16  ;;  %v3665_v25 = vcombine.low %v2131_v61, %v2135_v41  ;;  %v5516_v53 = vand.u32 127, %v1120_v63 }
 0x34c   :  { %v2926_v9 = vrot.slane %v2912_v21, %v4721_v16  ;;  %v3666_v28 = vcombine.low %v2139_v3, %v2143_v24  ;;  %v3673_v14 = vrot.slane %v3663_v23, %v4721_v16  ;;  %v3680_v10 = vrot.slane %v3664_v6, %v4721_v16 }
 0x34d   :  { %v3687_v29 = vrot.slane %v3665_v25, %v4721_v16  ;;  %v5493_v22 = vpop.permute.xlu1 %3731  ;;  %v3814_v0 = vadd.s32 4294967288, %v5516_v53  ;;  %v3812_v58 = vsub.s32 %v5516_v53, %v4687_v2  ;;  %v3821_v60 = vadd.s32 4294967280, %v5516_v53 }
 0x34e   :  { %v2927_v11 = vcombine.low %v2919_v7, %v2926_v9  ;;  %v3694_v47 = vrot.slane %v3666_v28, %v4721_v16  ;;  %v3695_v31 = vcombine.low %v3673_v14, %v3680_v10  ;;  %v5507_v26 = vpop.permute.xlu0 %3740  ;;  %v3835_v8 = vadd.s32 4294967264, %v5516_v53 }
 0x34f   :  { %v3817_v62 = vsub.s32 %v3814_v0, %v4687_v2  ;;  %v3828_v13 = vadd.s32 4294967272, %v5516_v53  ;;  %v3824_v15 = vsub.s32 %v3821_v60, %v4687_v2  ;;  %v3842_v61 = vadd.s32 4294967256, %v5516_v53 }
 0x350   :  { %3758 = vperm.xlu1 %4239, %v2927_v11   ;;  %v3696_v12 = vcombine.low %v3687_v29, %v3694_v47  ;;  %v3703_v54 = vrot.slane %v3695_v31, %v4721_v16  ;;  %v3838_v17 = vsub.s32 %v3835_v8, %v4687_v2  ;;  %v3813_v3 = vrot.slane %v3714_v20, %v3812_v58 }
 0x351   :  { %v5495_v38 = vpop.permute.xlu1 %3734  ;;  %v3831_v18 = vsub.s32 %v3828_v13, %v4687_v2  ;;  %v3818_v39 = vrot.slane %v3717_v27, %v3817_v62  ;;  %v3849_v21 = vadd.s32 4294967248, %v5516_v53  ;;  %v3845_v6 = vsub.s32 %v3842_v61, %v4687_v2 }
 0x352   :  { %v3710_v33 = vrot.slane %v3696_v12, %v4721_v16  ;;  %v3825_v25 = vrot.slane %v3720_v36, %v3824_v15  ;;  %v3856_v14 = vadd.s32 4294967240, %v5516_v53  ;;  %v3863_v47 = vadd.s32 4294967232, %v5516_v53 }
 0x353   :  { %v3820_v23 = vsel %vm3819_vm3, %v3818_v39, %v3813_v3  ;;  %v3852_v28 = vsub.s32 %v3849_v21, %v4687_v2  ;;  %v3832_v12 = vrot.slane %v5491_v37, %v3831_v18  ;;  %v3877_v60 = vadd.s32 4294967216, %v5516_v53 }
 0x354   :  { %v3711_v49 = vcombine.low %v3703_v54, %v3710_v33  ;;  %v3827_v29 = vsel %vm3826_vm4, %v3825_v25, %v3820_v23  ;;  %v3859_v36 = vsub.s32 %v3856_v14, %v4687_v2 }
 0x355   :  { %v5497_v34 = vpop.permute.xlu1 %3725  ;;  %v3834_v27 = vsel %vm3833_vm5, %v3832_v12, %v3827_v29 }
 0x356   :  { %3806 = vperm.xlu0 %4240, %v3711_v49   ;;  %v3839_v11 = vrot.slane %v5497_v34, %v3838_v17  ;;  %v3866_v34 = vsub.s32 %v3863_v47, %v4687_v2 }
 0x359   :  { %v5499_v35 = vpop.permute.xlu1 %3728 }
 0x35a   :  { %v3846_v54 = vrot.slane %v5499_v35, %v3845_v6  ;;  %v3853_v35 = vrot.slane %v5493_v22, %v3852_v28 }
 0x35f   :  { %v5501_v42 = vpop.permute.xlu1 %3743 }
 0x364   :  { %v3771_v48 = vpop.permute.xlu0 %3770 }
 0x365   :  { %v3936_v24 = vrot.slane %v3771_v48, %v3831_v18  ;;  %v3841_v48 = vsel %vm3840_vm6, %v3839_v11, %v3834_v27 }
 0x36a   :  { %v5503_v56 = vpop.permute.xlu1 %3746 }
 0x36f   :  { %v3765_v30 = vpop.permute.xlu0 %3764 }
 0x370   :  { %v3926_v32 = vrot.slane %v3765_v30, %v3817_v62 }
 0x375   :  { %v5505_v57 = vpop.permute.xlu1 %3737 }
 0x376   :  { %v3867_v62 = vrot.slane %v5505_v57, %v3866_v34  ;;  %v3898_v57 = vadd.s32 4294967192, %v5516_v53 }
 0x37a   :  { %v5513_v51 = vpop.permute.xlu0 %3782 }
 0x37b   :  { %v3956_v37 = vrot.slane %v5513_v51, %v3859_v36  ;;  %v3884_v51 = vadd.s32 4294967208, %v5516_v53 }
 0x37d   :  { %v3887_v61 = vsub.s32 %v3884_v51, %v4687_v2 }
 0x37f   :  { %v3888_v25 = vrot.slane %v5503_v56, %v3887_v61 }
 0x380   :  { %v5509_v1 = vpop.permute.xlu1 %3749 }
 0x385   :  { %v3777_v55 = vpop.permute.xlu0 %3776 }
 0x386   :  { %v3946_v10 = vrot.slane %v3777_v55, %v3845_v6 }
 0x38b   :  { %v5511_v45 = vpop.permute.xlu1 %3752 }
 0x390   :  { %v3768_v50 = vpop.permute.xlu1 %3767 }
 0x391   :  { %v3931_v46 = vrot.slane %v3768_v50, %v3824_v15  ;;  %v3870_v50 = vadd.s32 4294967224, %v5516_v53  ;;  %v3880_v15 = vsub.s32 %v3877_v60, %v4687_v2 }
 0x393   :  { %v3873_v8 = vsub.s32 %v3870_v50, %v4687_v2  ;;  %v3881_v3 = vrot.slane %v5501_v42, %v3880_v15 }
 0x396   :  { %v5524_v4 = vpop.permute.xlu0 %3791 }
 0x397   :  { %v3971_v18 = vrot.slane %v5524_v4, %v3880_v15 }
 0x39b   :  { %v3762_v52 = vpop.permute.xlu1 %3761 }
 0x39c   :  { %v3922_v44 = vrot.slane %v3762_v52, %v3812_v58  ;;  %v3848_v52 = vsel %vm3847_vm7, %v3846_v54, %v3841_v48 }
 0x39e   :  { %v3927_v40 = vsel %vm3819_vm3, %v3926_v32, %v3922_v44  ;;  %v3860_v44 = vrot.slane %v5495_v38, %v3859_v36 }
 0x39f   :  { %v3932_v5 = vsel %vm3826_vm4, %v3931_v46, %v3927_v40  ;;  %v3874_v46 = vrot.slane %v5507_v26, %v3873_v8  ;;  %v3901_v26 = vsub.s32 %v3898_v57, %v4687_v2 }
 0x3a0   :  { %v5533_v43 = vpop.permute.xlu0 %3794  ;;  %v3937_v7 = vsel %vm3833_vm5, %v3936_v24, %v3932_v5  ;;  %v3905_v24 = vadd.s32 4294967184, %v5516_v53 }
 0x3a1   :  { %v3976_v6 = vrot.slane %v5533_v43, %v3887_v61  ;;  %v3902_v11 = vrot.slane %v5511_v45, %v3901_v26 }
 0x3a2   :  { %v3908_v42 = vsub.s32 %v3905_v24, %v4687_v2 }
 0x3a5   :  { %v3780_v59 = vpop.permute.xlu1 %3779 }
 0x3a6   :  { %v3951_v49 = vrot.slane %v3780_v59, %v3852_v28  ;;  %v3855_v59 = vsel %vm3854_vm8, %v3853_v35, %v3848_v52 }
 0x3a7   :  { %v3862_v32 = vsel %vm3861_vm9, %v3860_v44, %v3855_v59 }
 0x3a8   :  { %v3869_v40 = vsel %vm3868_vm10, %v3867_v62, %v3862_v32 }
 0x3a9   :  { %v3876_v5 = vsel %vm3875_vm11, %v3874_v46, %v3869_v40 }
 0x3aa   :  { %v3883_v4 = vsel %vm3882_vm12, %v3881_v3, %v3876_v5 }
 0x3ab   :  { %v3789_v31 = vpop.permute.xlu0 %3788 }
 0x3ac   :  { %v3966_v22 = vrot.slane %v3789_v31, %v3873_v8 }
 0x3b0   :  { %v3774_v19 = vpop.permute.xlu1 %3773 }
 0x3b1   :  { %v3941_v41 = vrot.slane %v3774_v19, %v3838_v17  ;;  %v3891_v19 = vadd.s32 4294967200, %v5516_v53 }
 0x3b3   :  { %v3942_v9 = vsel %vm3840_vm6, %v3941_v41, %v3937_v7  ;;  %v3912_v41 = vadd.s32 4294967176, %v5516_v53  ;;  %v3894_v21 = vsub.s32 %v3891_v19, %v4687_v2  ;;  %v3890_v53 = vsel %vm3889_vm13, %v3888_v25, %v3883_v4 }
 0x3b4   :  { %v3947_v33 = vsel %vm3847_vm7, %v3946_v10, %v3942_v9 }
 0x3b5   :  { %v3952_v30 = vsel %vm3854_vm8, %v3951_v49, %v3947_v33  ;;  %v5554_v55 = vpop.permute.xlu0 %3803  ;;  %v3915_v28 = vsub.s32 %v3912_v41, %v4687_v2  ;;  %v3895_v14 = vrot.slane %v5509_v1, %v3894_v21 }
 0x3b6   :  { %v3957_v58 = vsel %vm3861_vm9, %v3956_v37, %v3952_v30  ;;  %v3991_v1 = vrot.slane %v5554_v55, %v3908_v42 }
 0x3b7   :  { %v3897_v56 = vsel %vm3896_vm14, %v3895_v14, %v3890_v53 }
 0x3b8   :  { %v3904_v54 = vsel %vm3903_vm15, %v3902_v11, %v3897_v56 }
 0x3ba   :  { %v3786_v20 = vpop.permute.xlu1 %3785 }
 0x3bb   :  { %v3961_v0 = vrot.slane %v3786_v20, %v3866_v34 }
 0x3bd   :  { %v3962_v13 = vsel %vm3868_vm10, %v3961_v0, %v3957_v58 }
 0x3be   :  { %v3967_v38 = vsel %vm3875_vm11, %v3966_v22, %v3962_v13 }
 0x3bf   :  { %v3972_v23 = vsel %vm3882_vm12, %v3971_v18, %v3967_v38 }
 0x3c0   :  { %v3798_v17 = vpop.permute.xlu0 %3797  ;;  %v3977_v9 = vsel %vm3889_vm13, %v3976_v6, %v3972_v23 }
 0x3c1   :  { %v3981_v10 = vrot.slane %v3798_v17, %v3894_v21 }
 0x3c3   :  { %v3982_v43 = vsel %vm3896_vm14, %v3981_v10, %v3977_v9 }
 0x3c5   :  { %v3756_v39 = vpop.permute.xlu1 %3755 }
 0x3c6   :  { %v3909_v31 = vrot.slane %v3756_v39, %v3908_v42 }
 0x3c8   :  { %v3911_v49 = vsel %vm3910_vm0, %v3909_v31, %v3904_v54 }
 0x3ca   :  { %v3801_v7 = vpop.permute.xlu0 %3800 }
 0x3cb   :  { %v3986_v47 = vrot.slane %v3801_v7, %v3901_v26 }
 0x3cd   :  { %v3987_v33 = vsel %vm3903_vm15, %v3986_v47, %v3982_v43 }
 0x3ce   :  { %v3992_v20 = vsel %vm3910_vm0, %v3991_v1, %v3987_v33 }
 0x3cf   :  { %v3759_v29 = vpop.permute.xlu1 %3758 }
 0x3d0   :  { %v3916_v12 = vrot.slane %v3759_v29, %v3915_v28 }
 0x3d2   :  { %v3918_v36 = vsel %vm3917_vm1, %v3916_v12, %v3911_v49 }
 0x3d5   :  { %v3807_v2 = vpop.permute.xlu0 %3806 }
 0x3d6   :  { %v3996_v27 = vrot.slane %v3807_v2, %v3915_v28 }
 0x3d8   :  { %v3997_v48 = vsel %vm3917_vm1, %v3996_v27, %v3992_v20 }
 0x3d9   :  { %v3998_v34 = vcombine.low %v3918_v36, %v3997_v48 }
 0x3db   :  { %v4005_v45 = vrot.slane %v3998_v34, %v4721_v16 }
 0x3dd   :  { %v4012_v30 = vrot.slane %v4005_v45, %v4721_v16 }
 0x3df   :  { %4018 = vst.msk [vmem:[#allocation6] sm:$0x3] %vm4016_vm2, %v4012_v30 }
 0x3e0   :  { %4423 = shalt.err (!%p4420_p12)
}
 0x3e1   :  { %s4424_s8 = scalar_lea.hbm %s5601_s7, 32 }
 0x3e2   :  { %p4425_p13 = scmp.ne.s32.totalorder %s5601_s7, %s4424_s8  ;;  %p4428_p0 = scmp.lt.u32.totalorder %s4424_s8, %s5601_s7 }
 0x3e4   :  { %p4430_p1 = pnand %p4428_p0, %p4425_p13 }
 0x3e6   :  { %4433 = shalt.err (!%p4430_p1)
}
 0x3e7   :  { %4028 = dma.vmem_to_hbm [thread:$0]  %s4026_s27, 32, %s5601_s7, [#allocation5]  }
 0x3e8   :  { %4436 = dma.done.wait [#allocation5], 32  }
 0x3e9   :  { %4437 = vsyncadd [#allocation5], 4294967264 }
 0x3ea   :  { %4032 = vsyncpa [#allocation4], 1 }
 0x3eb   :  { %4033 = vsyncpa [#allocation5], 1 }

</bundles_post_ra>
